<compile_context>
chip_gen: v7x
topology: tpu7x:2x2x1
jax: 0.10.0
libtpu: 0.0.40
codegen_flags: <defaults>
</compile_context>

<pallas_src>
import functools

import jax
import jax.numpy as jnp
import numpy as np
from jax.experimental import pallas as pl
from jax.experimental.pallas import tpu as pltpu


def _sparse_conv_kernel(x_ref, m_ref, w_ref, b_ref, y_ref, mo_ref,
                        *, Hc, Wc, K, Cin, Cout, Ho, Wo, s):
    # x_ref : (1, Hp, Wp, Cin+1)  zero-padded [mask*x, mask] (channels on lanes)
    # m_ref : (1, Hp, Wp)         zero-padded mask (W on lanes) for the max-pool
    # w_ref : (K, K, Cout+1, Cin+1) extended weight (row Cout = ones "count" kernel)
    # b_ref : (Cout, 1)
    # y_ref : (1, Cout, Hc*Wc)    lane-dense conv output
    # mo_ref: (1, Ho, Wo)         pooled mask
    C1 = Cin + 1
    HWc = Hc * Wc

    xall = x_ref[0]            # (Hp, Wp, C1)
    w = w_ref[...]             # (K, K, Cout+1, C1)

    # K*K MXU taps accumulated into a lane-dense (Cout+1, Hc*Wc) f32 accumulator.
    # dot_general contracting dims ((1,), (1,)) is the standard "A @ B^T" MXU form.
    res = jnp.zeros((Cout + 1, HWc), jnp.float32)
    for kh in range(K):
        for kw in range(K):
            # (Hc, Wc, C1) -> (Hc*Wc, C1): merges leading dims only, lane dim intact.
            patch = xall[kh:kh + Hc, kw:kw + Wc, :].reshape(HWc, C1)
            res = res + jax.lax.dot_general(
                w[kh, kw], patch,
                dimension_numbers=(((1,), (1,)), ((), ())),
                preferred_element_type=jnp.float32)      # (Cout+1, HWc)

    conv = res[:Cout, :]                                 # (Cout, HWc)
    cnt = res[Cout:Cout + 1, :]                          # (1, HWc)  ones-kernel conv
    d = cnt + 1e-8
    r = pl.reciprocal(d, approx=True)                    # EUP slot
    r = r * (2.0 - d * r)                                # one Newton step -> f32 accuracy
    y = jnp.maximum(conv * r + b_ref[...], 0.0)          # bias + ReLU, lane-dense
    y_ref[0] = y.astype(y_ref.dtype)

    # MaxPool2d(K, padding, stride) on the {0,1} validity mask.
    # Zero padding is equivalent to PyTorch's -inf padding here: the mask is
    # non-negative and padding < K guarantees every window holds a real pixel.
    mz = m_ref[0]                                        # (Hp, Wp), W on lanes
    mp = mz[0:(Ho - 1) * s + 1:s, 0:(Wo - 1) * s + 1:s]
    for kh in range(K):
        for kw in range(K):
            if kh == 0 and kw == 0:
                continue
            mp = jnp.maximum(mp, mz[kh:kh + (Ho - 1) * s + 1:s,
                                    kw:kw + (Wo - 1) * s + 1:s])
    mo_ref[0] = mp.astype(mo_ref.dtype)


def _build_extended_weight(weight_oikk):
    """(Cout, Cin, K, K) -> (K, K, Cout+1, Cin+1); row Cout is the ones count-kernel."""
    Cout, Cin, K, _ = weight_oikk.shape
    w_t = jnp.transpose(weight_oikk, (2, 3, 0, 1)).astype(jnp.float32)  # (K,K,Cout,Cin)
    w_ext = jnp.zeros((K, K, Cout + 1, Cin + 1), jnp.float32)
    w_ext = w_ext.at[:, :, :Cout, :Cin].set(w_t)
    w_ext = w_ext.at[:, :, Cout, Cin].set(1.0)
    return w_ext


def sparse_conv_forward(x_nchw, mask_nchw, weight_oikk, bias_o,
                        *, kernel_size, padding, stride):
    """Pallas SparseConv forward. Inputs/outputs in PyTorch NCHW layout."""
    N, Cin, H, W = x_nchw.shape
    Cout = weight_oikk.shape[0]
    K, p, s = kernel_size, padding, stride
    Hc = H + 2 * p - K + 1                 # conv output (stride 1)
    Wc = W + 2 * p - K + 1
    Ho = (H + 2 * p - K) // s + 1          # max-pool output (stride s)
    Wo = (W + 2 * p - K) // s + 1
    Hp, Wp = H + 2 * p, W + 2 * p
    C1 = Cin + 1

    # Single fused input prep: masked x with the mask appended as channel Cin, padded.
    m_nhwc = jnp.transpose(mask_nchw, (0, 2, 3, 1))            # (N, H, W, 1)
    x_nhwc = jnp.transpose(x_nchw, (0, 2, 3, 1))               # (N, H, W, Cin)
    xall = jnp.concatenate([x_nhwc * m_nhwc, m_nhwc], axis=-1) # (N, H, W, Cin+1)
    xall = jnp.pad(xall, ((0, 0), (p, p), (p, p), (0, 0)))
    m2d = jnp.pad(mask_nchw[:, 0], ((0, 0), (p, p), (p, p)))   # (N, Hp, Wp)

    w_ext = _build_extended_weight(weight_oikk)                # (K, K, Cout+1, Cin+1)
    b2 = bias_o.reshape(Cout, 1).astype(jnp.float32)

    kernel = functools.partial(_sparse_conv_kernel, Hc=Hc, Wc=Wc, K=K,
                               Cin=Cin, Cout=Cout, Ho=Ho, Wo=Wo, s=s)

    y_flat, mo = pl.pallas_call(
        kernel,
        out_shape=(jax.ShapeDtypeStruct((N, Cout, Hc * Wc), x_nchw.dtype),
                   jax.ShapeDtypeStruct((N, Ho, Wo), mask_nchw.dtype)),
        grid_spec=pltpu.PrefetchScalarGridSpec(
            num_scalar_prefetch=0,
            grid=(N,),
            in_specs=[
                pl.BlockSpec((1, Hp, Wp, C1), lambda n: (n, 0, 0, 0)),
                pl.BlockSpec((1, Hp, Wp), lambda n: (n, 0, 0)),
                pl.BlockSpec((K, K, Cout + 1, C1), lambda n: (0, 0, 0, 0)),
                pl.BlockSpec((Cout, 1), lambda n: (0, 0)),
            ],
            out_specs=[
                pl.BlockSpec((1, Cout, Hc * Wc), lambda n: (n, 0, 0)),
                pl.BlockSpec((1, Ho, Wo), lambda n: (n, 0, 0)),
            ],
        ),
        compiler_params=pltpu.CompilerParams(
            dimension_semantics=("parallel",)),
    )(xall, m2d, w_ext, b2)

    # Free, contiguous reshapes back to NCHW (no transposes on the output path).
    y = y_flat.reshape(N, Cout, Hc, Wc)
    mask_out = mo.reshape(N, 1, Ho, Wo)
    return y, mask_out


def _reference(x_nchw, mask_nchw, weight_oikk, bias_o, *, kernel_size, padding, stride):
    """Pure-JAX reference mirroring the PyTorch forward."""
    K, p, s = kernel_size, padding, stride
    xm = mask_nchw * x_nchw
    dn = ('NCHW', 'OIHW', 'NCHW')
    y = jax.lax.conv_general_dilated(xm, weight_oikk, (1, 1), [(p, p), (p, p)],
                                     dimension_numbers=dn)
    ones_w = jnp.ones((1, 1, K, K), jnp.float32)
    cnt = jax.lax.conv_general_dilated(mask_nchw, ones_w, (1, 1), [(p, p), (p, p)],
                                       dimension_numbers=dn)
    y = jnp.maximum(y * (1.0 / (cnt + 1e-08)) + bias_o.reshape(1, -1, 1, 1), 0.0)
    mpool = jax.lax.reduce_window(mask_nchw, -jnp.inf, jax.lax.max,
                                  window_dimensions=(1, 1, K, K),
                                  window_strides=(1, 1, s, s),
                                  padding=((0, 0), (0, 0), (p, p), (p, p)))
    return y, mpool


if __name__ == "__main__":
    # Module hyper-params (small, consistent with the PyTorch module).
    in_channels, out_channels = 4, 8
    kernel_size, padding, stride = 3, 1, 1
    N, H, W = 2, 16, 16

    key = jax.random.PRNGKey(0)
    k_x, k_m, k_w, k_b = jax.random.split(key, 4)

    # Deterministic inputs.
    x = jax.random.normal(k_x, (N, in_channels, H, W), dtype=jnp.float32)
    validity_mask = jax.random.bernoulli(k_m, 0.6, (N, 1, H, W)).astype(jnp.float32)

    # Deterministic synthetic parameters (shapes from __init__).
    fan_in = in_channels * kernel_size * kernel_size
    bound = 1.0 / np.sqrt(fan_in)
    conv_weight = jax.random.uniform(k_w, (out_channels, in_channels, kernel_size, kernel_size),
                                     minval=-bound, maxval=bound, dtype=jnp.float32)
    bias = jax.random.uniform(k_b, (out_channels,), dtype=jnp.float32)  # torch.rand([1,C,1,1])

    y, mask_out = sparse_conv_forward(x, validity_mask, conv_weight, bias,
                                      kernel_size=kernel_size, padding=padding, stride=stride)
    y, mask_out = jax.block_until_ready((y, mask_out))

    y_ref, mask_ref = _reference(x, validity_mask, conv_weight, bias,
                                 kernel_size=kernel_size, padding=padding, stride=stride)
    np.testing.assert_allclose(np.asarray(y), np.asarray(y_ref), rtol=1e-3, atol=1e-3)
    np.testing.assert_allclose(np.asarray(mask_out), np.asarray(mask_ref), rtol=0, atol=0)

    print("KERNEL_OK")
</pallas_src>

<mosaic_0001>
module attributes {stable_mosaic.version = 11 : i64} {
  func.func @_sparse_conv_kernel(%arg0: i32, %arg1: memref<1x18x18x5xf32, #tpu.memory_space<vmem>>, %arg2: memref<1x18x18xf32, #tpu.memory_space<vmem>>, %arg3: memref<3x3x9x5xf32, #tpu.memory_space<vmem>>, %arg4: memref<8x1xf32, #tpu.memory_space<vmem>>, %arg5: memref<1x8x256xf32, #tpu.memory_space<vmem>>, %arg6: memref<1x16x16xf32, #tpu.memory_space<vmem>>) attributes {dimension_semantics = [#tpu.dimension_semantics<parallel>], iteration_bounds = array<i64: 2>, scalar_prefetch = 0 : i64, scratch_operands = 0 : i64, tpu.core_type = #tpu.core_type<tc>, window_params = [{transform_indices = @transform_0, window_bounds = array<i64: 1, 18, 18, 5>}, {transform_indices = @transform_1, window_bounds = array<i64: 1, 18, 18>}, {pipeline_mode = #tpu.pipeline_mode<synchronous>, transform_indices = @transform_2, window_bounds = array<i64: 3, 3, 9, 5>}, {pipeline_mode = #tpu.pipeline_mode<synchronous>, transform_indices = @transform_3, window_bounds = array<i64: 8, 1>}, {transform_indices = @transform_4, window_bounds = array<i64: 1, 8, 256>}, {transform_indices = @transform_5, window_bounds = array<i64: 1, 16, 16>}]} {
    %c0 = arith.constant 0 : index
    %c0_0 = arith.constant 0 : index
    %c0_1 = arith.constant 0 : index
    %c0_2 = arith.constant 0 : index
    %0 = vector.load %arg1[%c0, %c0_0, %c0_1, %c0_2] : memref<1x18x18x5xf32, #tpu.memory_space<vmem>>, vector<1x18x18x5xf32>
    %1 = vector.shape_cast %0 : vector<1x18x18x5xf32> to vector<18x18x5xf32>
    %c0_3 = arith.constant 0 : index
    %c0_4 = arith.constant 0 : index
    %c0_5 = arith.constant 0 : index
    %c0_6 = arith.constant 0 : index
    %2 = vector.load %arg3[%c0_3, %c0_4, %c0_5, %c0_6] : memref<3x3x9x5xf32, #tpu.memory_space<vmem>>, vector<3x3x9x5xf32>
    %cst = arith.constant 0.000000e+00 : f32
    %3 = vector.broadcast %cst : f32 to vector<9x256xf32>
    %4 = vector.extract_strided_slice %1 {offsets = [0, 0, 0], sizes = [16, 16, 5], strides = [1, 1, 1]} : vector<18x18x5xf32> to vector<16x16x5xf32>
    %5 = vector.shape_cast %4 : vector<16x16x5xf32> to vector<256x5xf32>
    %6 = vector.extract_strided_slice %2 {offsets = [0, 0, 0, 0], sizes = [1, 1, 9, 5], strides = [1, 1, 1, 1]} : vector<3x3x9x5xf32> to vector<1x1x9x5xf32>
    %7 = vector.shape_cast %6 : vector<1x1x9x5xf32> to vector<9x5xf32>
    %cst_7 = arith.constant dense<0.000000e+00> : vector<9x256xf32>
    %8 = tpu.matmul %7, %5, %cst_7 {dimension_numbers = #tpu.dot_dimension_numbers<[1], [1], [0], [0], [0, 0, 1, 0], [], []>} : vector<9x5xf32>, vector<256x5xf32>, vector<9x256xf32> -> vector<9x256xf32>
    %9 = arith.addf %3, %8 : vector<9x256xf32>
    %10 = vector.extract_strided_slice %1 {offsets = [0, 1, 0], sizes = [16, 16, 5], strides = [1, 1, 1]} : vector<18x18x5xf32> to vector<16x16x5xf32>
    %11 = vector.shape_cast %10 : vector<16x16x5xf32> to vector<256x5xf32>
    %12 = vector.extract_strided_slice %2 {offsets = [0, 1, 0, 0], sizes = [1, 1, 9, 5], strides = [1, 1, 1, 1]} : vector<3x3x9x5xf32> to vector<1x1x9x5xf32>
    %13 = vector.shape_cast %12 : vector<1x1x9x5xf32> to vector<9x5xf32>
    %cst_8 = arith.constant dense<0.000000e+00> : vector<9x256xf32>
    %14 = tpu.matmul %13, %11, %cst_8 {dimension_numbers = #tpu.dot_dimension_numbers<[1], [1], [0], [0], [0, 0, 1, 0], [], []>} : vector<9x5xf32>, vector<256x5xf32>, vector<9x256xf32> -> vector<9x256xf32>
    %15 = arith.addf %9, %14 : vector<9x256xf32>
    %16 = vector.extract_strided_slice %1 {offsets = [0, 2, 0], sizes = [16, 16, 5], strides = [1, 1, 1]} : vector<18x18x5xf32> to vector<16x16x5xf32>
    %17 = vector.shape_cast %16 : vector<16x16x5xf32> to vector<256x5xf32>
    %18 = vector.extract_strided_slice %2 {offsets = [0, 2, 0, 0], sizes = [1, 1, 9, 5], strides = [1, 1, 1, 1]} : vector<3x3x9x5xf32> to vector<1x1x9x5xf32>
    %19 = vector.shape_cast %18 : vector<1x1x9x5xf32> to vector<9x5xf32>
    %cst_9 = arith.constant dense<0.000000e+00> : vector<9x256xf32>
    %20 = tpu.matmul %19, %17, %cst_9 {dimension_numbers = #tpu.dot_dimension_numbers<[1], [1], [0], [0], [0, 0, 1, 0], [], []>} : vector<9x5xf32>, vector<256x5xf32>, vector<9x256xf32> -> vector<9x256xf32>
    %21 = arith.addf %15, %20 : vector<9x256xf32>
    %22 = vector.extract_strided_slice %1 {offsets = [1, 0, 0], sizes = [16, 16, 5], strides = [1, 1, 1]} : vector<18x18x5xf32> to vector<16x16x5xf32>
    %23 = vector.shape_cast %22 : vector<16x16x5xf32> to vector<256x5xf32>
    %24 = vector.extract_strided_slice %2 {offsets = [1, 0, 0, 0], sizes = [1, 1, 9, 5], strides = [1, 1, 1, 1]} : vector<3x3x9x5xf32> to vector<1x1x9x5xf32>
    %25 = vector.shape_cast %24 : vector<1x1x9x5xf32> to vector<9x5xf32>
    %cst_10 = arith.constant dense<0.000000e+00> : vector<9x256xf32>
    %26 = tpu.matmul %25, %23, %cst_10 {dimension_numbers = #tpu.dot_dimension_numbers<[1], [1], [0], [0], [0, 0, 1, 0], [], []>} : vector<9x5xf32>, vector<256x5xf32>, vector<9x256xf32> -> vector<9x256xf32>
    %27 = arith.addf %21, %26 : vector<9x256xf32>
    %28 = vector.extract_strided_slice %1 {offsets = [1, 1, 0], sizes = [16, 16, 5], strides = [1, 1, 1]} : vector<18x18x5xf32> to vector<16x16x5xf32>
    %29 = vector.shape_cast %28 : vector<16x16x5xf32> to vector<256x5xf32>
    %30 = vector.extract_strided_slice %2 {offsets = [1, 1, 0, 0], sizes = [1, 1, 9, 5], strides = [1, 1, 1, 1]} : vector<3x3x9x5xf32> to vector<1x1x9x5xf32>
    %31 = vector.shape_cast %30 : vector<1x1x9x5xf32> to vector<9x5xf32>
    %cst_11 = arith.constant dense<0.000000e+00> : vector<9x256xf32>
    %32 = tpu.matmul %31, %29, %cst_11 {dimension_numbers = #tpu.dot_dimension_numbers<[1], [1], [0], [0], [0, 0, 1, 0], [], []>} : vector<9x5xf32>, vector<256x5xf32>, vector<9x256xf32> -> vector<9x256xf32>
    %33 = arith.addf %27, %32 : vector<9x256xf32>
    %34 = vector.extract_strided_slice %1 {offsets = [1, 2, 0], sizes = [16, 16, 5], strides = [1, 1, 1]} : vector<18x18x5xf32> to vector<16x16x5xf32>
    %35 = vector.shape_cast %34 : vector<16x16x5xf32> to vector<256x5xf32>
    %36 = vector.extract_strided_slice %2 {offsets = [1, 2, 0, 0], sizes = [1, 1, 9, 5], strides = [1, 1, 1, 1]} : vector<3x3x9x5xf32> to vector<1x1x9x5xf32>
    %37 = vector.shape_cast %36 : vector<1x1x9x5xf32> to vector<9x5xf32>
    %cst_12 = arith.constant dense<0.000000e+00> : vector<9x256xf32>
    %38 = tpu.matmul %37, %35, %cst_12 {dimension_numbers = #tpu.dot_dimension_numbers<[1], [1], [0], [0], [0, 0, 1, 0], [], []>} : vector<9x5xf32>, vector<256x5xf32>, vector<9x256xf32> -> vector<9x256xf32>
    %39 = arith.addf %33, %38 : vector<9x256xf32>
    %40 = vector.extract_strided_slice %1 {offsets = [2, 0, 0], sizes = [16, 16, 5], strides = [1, 1, 1]} : vector<18x18x5xf32> to vector<16x16x5xf32>
    %41 = vector.shape_cast %40 : vector<16x16x5xf32> to vector<256x5xf32>
    %42 = vector.extract_strided_slice %2 {offsets = [2, 0, 0, 0], sizes = [1, 1, 9, 5], strides = [1, 1, 1, 1]} : vector<3x3x9x5xf32> to vector<1x1x9x5xf32>
    %43 = vector.shape_cast %42 : vector<1x1x9x5xf32> to vector<9x5xf32>
    %cst_13 = arith.constant dense<0.000000e+00> : vector<9x256xf32>
    %44 = tpu.matmul %43, %41, %cst_13 {dimension_numbers = #tpu.dot_dimension_numbers<[1], [1], [0], [0], [0, 0, 1, 0], [], []>} : vector<9x5xf32>, vector<256x5xf32>, vector<9x256xf32> -> vector<9x256xf32>
    %45 = arith.addf %39, %44 : vector<9x256xf32>
    %46 = vector.extract_strided_slice %1 {offsets = [2, 1, 0], sizes = [16, 16, 5], strides = [1, 1, 1]} : vector<18x18x5xf32> to vector<16x16x5xf32>
    %47 = vector.shape_cast %46 : vector<16x16x5xf32> to vector<256x5xf32>
    %48 = vector.extract_strided_slice %2 {offsets = [2, 1, 0, 0], sizes = [1, 1, 9, 5], strides = [1, 1, 1, 1]} : vector<3x3x9x5xf32> to vector<1x1x9x5xf32>
    %49 = vector.shape_cast %48 : vector<1x1x9x5xf32> to vector<9x5xf32>
    %cst_14 = arith.constant dense<0.000000e+00> : vector<9x256xf32>
    %50 = tpu.matmul %49, %47, %cst_14 {dimension_numbers = #tpu.dot_dimension_numbers<[1], [1], [0], [0], [0, 0, 1, 0], [], []>} : vector<9x5xf32>, vector<256x5xf32>, vector<9x256xf32> -> vector<9x256xf32>
    %51 = arith.addf %45, %50 : vector<9x256xf32>
    %52 = vector.extract_strided_slice %1 {offsets = [2, 2, 0], sizes = [16, 16, 5], strides = [1, 1, 1]} : vector<18x18x5xf32> to vector<16x16x5xf32>
    %53 = vector.shape_cast %52 : vector<16x16x5xf32> to vector<256x5xf32>
    %54 = vector.extract_strided_slice %2 {offsets = [2, 2, 0, 0], sizes = [1, 1, 9, 5], strides = [1, 1, 1, 1]} : vector<3x3x9x5xf32> to vector<1x1x9x5xf32>
    %55 = vector.shape_cast %54 : vector<1x1x9x5xf32> to vector<9x5xf32>
    %cst_15 = arith.constant dense<0.000000e+00> : vector<9x256xf32>
    %56 = tpu.matmul %55, %53, %cst_15 {dimension_numbers = #tpu.dot_dimension_numbers<[1], [1], [0], [0], [0, 0, 1, 0], [], []>} : vector<9x5xf32>, vector<256x5xf32>, vector<9x256xf32> -> vector<9x256xf32>
    %57 = arith.addf %51, %56 : vector<9x256xf32>
    %58 = vector.extract_strided_slice %57 {offsets = [0, 0], sizes = [8, 256], strides = [1, 1]} : vector<9x256xf32> to vector<8x256xf32>
    %59 = vector.extract_strided_slice %57 {offsets = [8, 0], sizes = [1, 256], strides = [1, 1]} : vector<9x256xf32> to vector<1x256xf32>
    %cst_16 = arith.constant 9.99999993E-9 : f32
    %60 = vector.broadcast %cst_16 : f32 to vector<1x256xf32>
    %61 = arith.addf %59, %60 : vector<1x256xf32>
    %62 = tpu.reciprocal %61 {approx = true} : vector<1x256xf32> -> vector<1x256xf32>
    %63 = arith.mulf %61, %62 : vector<1x256xf32>
    %cst_17 = arith.constant 2.000000e+00 : f32
    %64 = vector.broadcast %cst_17 : f32 to vector<1x256xf32>
    %65 = arith.subf %64, %63 : vector<1x256xf32>
    %66 = arith.mulf %62, %65 : vector<1x256xf32>
    %67 = vector.broadcast %66 : vector<1x256xf32> to vector<8x256xf32>
    %68 = arith.mulf %58, %67 : vector<8x256xf32>
    %c0_18 = arith.constant 0 : index
    %c0_19 = arith.constant 0 : index
    %69 = vector.load %arg4[%c0_18, %c0_19] : memref<8x1xf32, #tpu.memory_space<vmem>>, vector<8x1xf32>
    %70 = vector.broadcast %69 : vector<8x1xf32> to vector<8x256xf32>
    %71 = arith.addf %68, %70 : vector<8x256xf32>
    %cst_20 = arith.constant 0.000000e+00 : f32
    %72 = vector.broadcast %cst_20 : f32 to vector<8x256xf32>
    %73 = arith.maximumf %71, %72 : vector<8x256xf32>
    %c0_21 = arith.constant 0 : index
    %c0_22 = arith.constant 0 : index
    %c0_23 = arith.constant 0 : index
    %74 = vector.load %arg5[%c0_21, %c0_22, %c0_23] : memref<1x8x256xf32, #tpu.memory_space<vmem>>, vector<1x8x256xf32>
    %75 = vector.shape_cast %74 : vector<1x8x256xf32> to vector<8x256xf32>
    %76 = vector.shape_cast %73 : vector<8x256xf32> to vector<1x8x256xf32>
    tpu.vector_store %arg5[%c0_21, %c0_22, %c0_23], %76 {strides = array<i32>} : memref<1x8x256xf32, #tpu.memory_space<vmem>>, vector<1x8x256xf32>,
    %c0_24 = arith.constant 0 : index
    %c0_25 = arith.constant 0 : index
    %c0_26 = arith.constant 0 : index
    %77 = vector.load %arg2[%c0_24, %c0_25, %c0_26] : memref<1x18x18xf32, #tpu.memory_space<vmem>>, vector<1x18x18xf32>
    %78 = vector.shape_cast %77 : vector<1x18x18xf32> to vector<18x18xf32>
    %79 = vector.extract_strided_slice %78 {offsets = [0, 0], sizes = [16, 16], strides = [1, 1]} : vector<18x18xf32> to vector<16x16xf32>
    %80 = vector.extract_strided_slice %78 {offsets = [0, 1], sizes = [16, 16], strides = [1, 1]} : vector<18x18xf32> to vector<16x16xf32>
    %81 = arith.maximumf %79, %80 : vector<16x16xf32>
    %82 = vector.extract_strided_slice %78 {offsets = [0, 2], sizes = [16, 16], strides = [1, 1]} : vector<18x18xf32> to vector<16x16xf32>
    %83 = arith.maximumf %81, %82 : vector<16x16xf32>
    %84 = vector.extract_strided_slice %78 {offsets = [1, 0], sizes = [16, 16], strides = [1, 1]} : vector<18x18xf32> to vector<16x16xf32>
    %85 = arith.maximumf %83, %84 : vector<16x16xf32>
    %86 = vector.extract_strided_slice %78 {offsets = [1, 1], sizes = [16, 16], strides = [1, 1]} : vector<18x18xf32> to vector<16x16xf32>
    %87 = arith.maximumf %85, %86 : vector<16x16xf32>
    %88 = vector.extract_strided_slice %78 {offsets = [1, 2], sizes = [16, 16], strides = [1, 1]} : vector<18x18xf32> to vector<16x16xf32>
    %89 = arith.maximumf %87, %88 : vector<16x16xf32>
    %90 = vector.extract_strided_slice %78 {offsets = [2, 0], sizes = [16, 16], strides = [1, 1]} : vector<18x18xf32> to vector<16x16xf32>
    %91 = arith.maximumf %89, %90 : vector<16x16xf32>
    %92 = vector.extract_strided_slice %78 {offsets = [2, 1], sizes = [16, 16], strides = [1, 1]} : vector<18x18xf32> to vector<16x16xf32>
    %93 = arith.maximumf %91, %92 : vector<16x16xf32>
    %94 = vector.extract_strided_slice %78 {offsets = [2, 2], sizes = [16, 16], strides = [1, 1]} : vector<18x18xf32> to vector<16x16xf32>
    %95 = arith.maximumf %93, %94 : vector<16x16xf32>
    %c0_27 = arith.constant 0 : index
    %c0_28 = arith.constant 0 : index
    %c0_29 = arith.constant 0 : index
    %96 = vector.load %arg6[%c0_27, %c0_28, %c0_29] : memref<1x16x16xf32, #tpu.memory_space<vmem>>, vector<1x16x16xf32>
    %97 = vector.shape_cast %96 : vector<1x16x16xf32> to vector<16x16xf32>
    %98 = vector.shape_cast %95 : vector<16x16xf32> to vector<1x16x16xf32>
    tpu.vector_store %arg6[%c0_27, %c0_28, %c0_29], %98 {strides = array<i32>} : memref<1x16x16xf32, #tpu.memory_space<vmem>>, vector<1x16x16xf32>,
    return
  }
  func.func @transform_0(%arg0: i32) -> (i32, i32, i32, i32) {
    %c0_i32 = arith.constant 0 : i32
    %c0_i32_0 = arith.constant 0 : i32
    %c0_i32_1 = arith.constant 0 : i32
    %c0_i32_2 = arith.constant 0 : i32
    return %arg0, %c0_i32, %c0_i32_0, %c0_i32_1 : i32, i32, i32, i32
  }
  func.func @transform_1(%arg0: i32) -> (i32, i32, i32) {
    %c0_i32 = arith.constant 0 : i32
    %c0_i32_0 = arith.constant 0 : i32
    %c0_i32_1 = arith.constant 0 : i32
    return %arg0, %c0_i32, %c0_i32_0 : i32, i32, i32
  }
  func.func @transform_2(%arg0: i32) -> (i32, i32, i32, i32) {
    %c0_i32 = arith.constant 0 : i32
    %c0_i32_0 = arith.constant 0 : i32
    %c0_i32_1 = arith.constant 0 : i32
    %c0_i32_2 = arith.constant 0 : i32
    %c0_i32_3 = arith.constant 0 : i32
    return %c0_i32, %c0_i32_0, %c0_i32_1, %c0_i32_2 : i32, i32, i32, i32
  }
  func.func @transform_3(%arg0: i32) -> (i32, i32) {
    %c0_i32 = arith.constant 0 : i32
    %c0_i32_0 = arith.constant 0 : i32
    %c0_i32_1 = arith.constant 0 : i32
    return %c0_i32, %c0_i32_0 : i32, i32
  }
  func.func @transform_4(%arg0: i32) -> (i32, i32, i32) {
    %c0_i32 = arith.constant 0 : i32
    %c0_i32_0 = arith.constant 0 : i32
    %c0_i32_1 = arith.constant 0 : i32
    return %arg0, %c0_i32, %c0_i32_0 : i32, i32, i32
  }
  func.func @transform_5(%arg0: i32) -> (i32, i32, i32) {
    %c0_i32 = arith.constant 0 : i32
    %c0_i32_0 = arith.constant 0 : i32
    %c0_i32_1 = arith.constant 0 : i32
    return %arg0, %c0_i32, %c0_i32_0 : i32, i32, i32
  }
}

</mosaic_0001>

<bundles_post_ra>
// kernel: tpu_custom_call.1
= control target key start
LH: loop header
LB: loop body
LE: loop exit
PB: predicated region body
PF: predicated region fallthrough
CT: control target
= control target key end

     0   :  { %11 = vsyncpa [#allocation3], 0  ;;  %s4437_s0 = inlined_call_operand.vmem [shape: f32[2,18,18,5], index: 0, kind: input, shape index: {}]   ;;  %s4438_s1 = inlined_call_operand.vmem [shape: f32[2,18,18], index: 1, kind: input, shape index: {}]   ;;  %s4439_s2 = inlined_call_operand.vmem [shape: f32[3,3,9,5], index: 2, kind: input, shape index: {}]   ;;  %s4440_s3 = inlined_call_operand.vmem [shape: f32[8,1], index: 3, kind: input, shape index: {}]   ;;  %s4441_s4 = inlined_call_operand.hbm [shape: f32[2,8,256], index: 4, kind: output, shape index: {0}]   ;;  %s4442_s5 = inlined_call_operand.hbm [shape: f32[2,16,16], index: 5, kind: output, shape index: {1}]  }
   0x1   :  { %13 = vsyncpa [#allocation3 + $0x1], 0 }
   0x2   :  { %14 = vsyncpa [#allocation5], 0 }
   0x3   :  { %16 = vsyncpa [#allocation5 + $0x1], 0  ;;  %s3117_s18 = smov 0   ;;  %s3119_s19 = smov 0  }
   0x4   :  { %s3121_s20 = smov 0   ;;  %s3123_s21 = smov 0  }
   0x5 LB: > { %s3138_s22 = sadd.s32 4294967295, %s3078_s21   ;;  %s1800_s23 = sadd.s32 4294967294, %s3078_s21   ;;  %s3078_s21 = sphi %s3123_s21, %s4546_s21   ;;  %s3074_s20 = sphi %s3121_s20, %s4545_s20   ;;  %s3070_s19 = sphi %s3119_s19, %s4544_s19   ;;  %s3066_s18 = sphi %s3117_s18, %s4543_s18  }
   0x6   : > { %s3142_s24 = sadd.s32 1, %s3078_s21   ;;  %s123_s25 = sadd.s32 1, %s3074_s20 }
   0x7   : > { %s120_s26 = ssub.s32 %s3078_s21, %s3142_s24  ;;  %p133_p0 = scmp.ne.s32.totalorder %s3074_s20, %s3070_s19 }
   0x8   : > { %p121_p1 = scmp.eq.s32.totalorder %s120_s26, 0  ;;  %p134_p2 = scmp.eq.s32.totalorder %s3138_s22, 1 }
   0x9   : > { %p139_p3 = scmp.ne.s32.totalorder %s3070_s19, %s3066_s18  ;;  %p140_p4 = scmp.eq.s32.totalorder %s1800_s23, 1 }
   0xa   : > { %s3153_s27 = scalar_select %p121_p1, %s3074_s20, %s123_s25  }
   0xb   : > { %p3155_p5 = por %p134_p2, %p133_p0  ;;  %p3159_p6 = por %p140_p4, %p139_p3 }
   0xc   : > { %p1803_p7 = scmp.ge.s32.totalorder %s3078_s21, 1  ;;  %p206_p8 = scmp.lt.s32.totalorder %s3078_s21, 3 }
   0xe   : > { %p207_p9 = pnand %p1803_p7, %p206_p8 }
  0x10   : > { %210 = sbr.rel (%p207_p9) target bundleno = 615 (0x267), region = 36 }
  0x17   : > { %p244_p10 = scmp.lt.s32.totalorder %s3138_s22, 1  ;;  %vm455_vm0 = vcmask 39936   ;;  %v3169_v0 = vld [vmem:[%s4439_s2 + $0x10] sm:$0xff]  ;;  %v3174_v1 = vld [vmem:[%s4439_s2 + $0x40] sm:$0xff]  ;;  %vm374_vm1 = vcmask 1046528   ;;  %vm750_vm3 = vcmask 1045504  }
  0x18   : > { %4480 = vst [vmem:[#allocation8_spill] sm:$0xff] %v3169_v0  ;;  %4481 = vst [vmem:[#allocation9_spill] sm:$0xff] %v3174_v1  ;;  %2156 = vmatprep.mubr.msk.f32.mxu1 %vm455_vm0, %v3169_v0  ;;  %2300 = vmatprep.mubr.msk.f32.mxu0 %vm455_vm0, %v3174_v1  ;;  %s3081_s11 = smov 127   ;;  %s3082_s12 = smov 126   ;;  %vm1658_vm4 = vcmask 130048  }
  0x19   : > { %s3181_s9 = scalar_select %p244_p10, %s3138_s22, 1  ;;  %vm3209_vm2 = vmpackc.low %vm455_vm0, %vm455_vm0 }
  0x1a   : > { %s4345_s7 = sand.u32 1, %s3070_s19   ;;  %s3083_s17 = smov [#allocation4]  }
  0x1b   : > { %s2928_s10 = smul.u32 432, %s3181_s9  ;;  %s1804_s8 = sshll.u32 %s4345_s7, 4 }
  0x1c   : > { %s2929_s30 = smul.u32 24, %s3181_s9  ;;  %s2988_s23 = sshll.u32 %s3083_s17, 4  ;;  %s2989_s23 = int_to_ptr.vmem [resolvable:$false] %s2988_s23 }
  0x1d   : > { %s3187_s13 = scalar_lea.vmem %s4437_s0, %s2928_s10  ;;  %s243_s10 = scalar_lea.vmem [#allocation4], %s1804_s8 }
  0x1e   : > { %v3190_v2 = vld [vmem:[%s3187_s13 + $0xc0] sm:$0xff]  ;;  %v3193_v3 = vld [vmem:[%s3187_s13 + $0xc8] sm:$0xff]  ;;  %v3196_v4 = vld [vmem:[%s3187_s13 + $0xd0] sm:$0x3]  ;;  %s253_s9 = scalar_lea.vmem %s4438_s1, %s2929_s30  ;;  %s2990_s25 = scalar_lea.vmem %s2989_s23, 512 }
  0x1f   : > { %4482 = vst [vmem:[#allocation10_spill] sm:$0xff] %v3196_v4  ;;  %v415_v5 = vrot.slane %v3190_v2, 1  ;;  %v416_v6 = vrot.slane %v3193_v3, 1  ;;  %v418_v7 = vrot.slane %v3196_v4, 1  ;;  %v3202_v8 = vld [vmem:[%s3187_s13 + $0xd8] sm:$0xff]  ;;  %v3205_v9 = vld [vmem:[%s3187_s13 + $0xe0] sm:$0xff] }
  0x20   : > { %v3214_v11 = vld [vmem:[%s3187_s13 + $0xe8] sm:$0x3]  ;;  %v420_v12 = vrot.slane %v3202_v8, 1  ;;  %v421_v13 = vrot.slane %v3205_v9, 1  ;;  %v3222_v17 = vld [vmem:[%s3187_s13] sm:$0xff]  ;;  %v3236_v24 = vld [vmem:[%s3187_s13 + $0x18] sm:$0xff] }
  0x21   : > { %4485 = vst [vmem:[#allocation11_spill] sm:$0xff] %v3214_v11  ;;  %v417_v14 = vsel %vm374_vm1, %v415_v5, %v416_v6  ;;  %v419_v15 = vsel %vm374_vm1, %v416_v6, %v418_v7  ;;  %v423_v16 = vrot.slane %v3214_v11, 1  ;;  %4486 = vst [vmem:[#allocation12_spill] sm:$0xff] %v3222_v17  ;;  %v3225_v18 = vld [vmem:[%s3187_s13 + $0x8] sm:$0xff]  ;;  %v3228_v19 = vld [vmem:[%s3187_s13 + $0x10] sm:$0x3] }
  0x22   : > { %4487 = vst [vmem:[#allocation13_spill] sm:$0xff] %v3225_v18  ;;  %4488 = vst [vmem:[#allocation14_spill] sm:$0xff] %v3228_v19  ;;  %v3230_v20 = vpack.c.bf16 %v419_v15, %v417_v14  ;;  %v422_v21 = vsel %vm374_vm1, %v420_v12, %v421_v13  ;;  %v375_v22 = vrot.slane %v3222_v17, 1  ;;  %v376_v23 = vrot.slane %v3225_v18, 1  ;;  %v3239_v25 = vld [vmem:[%s3187_s13 + $0x20] sm:$0xff]  ;;  %v3247_v29 = vld [vmem:[%s3187_s13 + $0xf0] sm:$0xff] }
  0x23   : > { %v3242_v26 = vld [vmem:[%s3187_s13 + $0x28] sm:$0x3]  ;;  %v424_v27 = vsel %vm374_vm1, %v421_v13, %v423_v16  ;;  %v378_v28 = vrot.slane %v3228_v19, 1  ;;  %v380_v32 = vrot.slane %v3236_v24, 1  ;;  %v3257_v33 = vld [vmem:[%s3187_s13 + $0xf8] sm:$0xff]  ;;  %v381_v36 = vrot.slane %v3239_v25, 1 }
  0x24   : > { %4489 = vst [vmem:[#allocation15_spill] sm:$0xff] %v3230_v20  ;;  %2450 = vmatprep.subr.msk.bf16.mxu1 %vm3209_vm2, %v3230_v20  ;;  %v3252_v30 = vpack.c.bf16 %v424_v27, %v422_v21  ;;  %v377_v31 = vsel %vm374_vm1, %v375_v22, %v376_v23  ;;  %v3260_v34 = vld [vmem:[%s3187_s13 + $0x100] sm:$0x3]  ;;  %v383_v37 = vrot.slane %v3242_v26, 1  ;;  %v3266_v38 = vld [vmem:[%s3187_s13 + $0x30] sm:$0xff]  ;;  %v3269_v39 = vld [vmem:[%s3187_s13 + $0x38] sm:$0xff] }
  0x25   : > { %4491 = vst [vmem:[#allocation17_spill] sm:$0xff] %v3260_v34  ;;  %v379_v35 = vsel %vm374_vm1, %v376_v23, %v378_v28  ;;  %v3272_v40 = vld [vmem:[%s3187_s13 + $0x40] sm:$0x3]  ;;  %v425_v42 = vrot.slane %v3247_v29, 1  ;;  %v3279_v43 = vld [vmem:[%s3187_s13 + $0x108] sm:$0xff]  ;;  %v382_v44 = vsel %vm374_vm1, %v380_v32, %v381_v36  ;;  %v426_v46 = vrot.slane %v3257_v33, 1 }
  0x26   : > { %4490 = vst [vmem:[#allocation16_spill] sm:$0xff] %v3252_v30  ;;  %2642 = vmatprep.subr.msk.bf16.mxu0 %vm3209_vm2, %v3252_v30  ;;  %v2451_v41 = vpack.c.bf16 %v379_v35, %v377_v31  ;;  %v384_v45 = vsel %vm374_vm1, %v381_v36, %v383_v37  ;;  %v428_v47 = vrot.slane %v3260_v34, 1  ;;  %v3286_v48 = vld [vmem:[%s3187_s13 + $0x110] sm:$0xff]  ;;  %v3289_v49 = vld [vmem:[%s3187_s13 + $0x118] sm:$0x3]  ;;  %v385_v51 = vrot.slane %v3266_v38, 1 }
  0x27   : > { %v2457_v50 = vpack.c.bf16 %v384_v45, %v382_v44  ;;  %v386_v52 = vrot.slane %v3269_v39, 1  ;;  %v388_v53 = vrot.slane %v3272_v40, 1  ;;  %v3297_v54 = vld [vmem:[%s3187_s13 + $0x48] sm:$0xff]  ;;  %v3300_v55 = vld [vmem:[%s3187_s13 + $0x50] sm:$0xff]  ;;  %v427_v57 = vsel %vm374_vm1, %v425_v42, %v426_v46  ;;  %v3310_v60 = vld [vmem:[%s3187_s13 + $0x58] sm:$0x3] }
  0x28   : > { %2453 = vmatpush3.bf16.xpose.msk.msra.mxu1 %vm3209_vm2, %v2451_v41  ;;  %v429_v58 = vsel %vm374_vm1, %v426_v46, %v428_v47  ;;  %v430_v59 = vrot.slane %v3279_v43, 1  ;;  %v431_v5 = vrot.slane %v3286_v48, 1  ;;  %v433_v7 = vrot.slane %v3289_v49, 1  ;;  %v3324_v14 = vld [vmem:[%s3187_s13 + $0x120] sm:$0xff]  ;;  %v3333_v22 = vld [vmem:[%s3187_s13 + $0x128] sm:$0xff]  ;;  %v3351_v37 = vld [vmem:[%s3187_s13 + $0x138] sm:$0xff] }
  0x29   : > { %2456 = vmatprep.subr.msk.bf16.mxu1 %vm3209_vm2, %v3252_v30  ;;  %2645 = vmatpush3.bf16.xpose.msk.msra.mxu0 %vm3209_vm2, %v2457_v50  ;;  %v3315_v62 = vpack.c.bf16 %v429_v58, %v427_v57  ;;  %v387_v63 = vsel %vm374_vm1, %v385_v51, %v386_v52  ;;  %v389_v6 = vsel %vm374_vm1, %v386_v52, %v388_v53  ;;  %v390_v12 = vrot.slane %v3297_v54, 1  ;;  %v3336_v23 = vld [vmem:[%s3187_s13 + $0x130] sm:$0x3]  ;;  %v3339_v27 = vld [vmem:[%s3187_s13 + $0x60] sm:$0xff]  ;;  %v3345_v35 = vld [vmem:[%s3187_s13 + $0x68] sm:$0xff] }
  0x2a   : > { %v391_v13 = vrot.slane %v3300_v55, 1  ;;  %v432_v16 = vsel %vm374_vm1, %v430_v59, %v431_v5  ;;  %v393_v21 = vrot.slane %v3310_v60, 1  ;;  %v434_v32 = vsel %vm374_vm1, %v431_v5, %v433_v7  ;;  %v3348_v36 = vld [vmem:[%s3187_s13 + $0x70] sm:$0x3]  ;;  %v3359_v46 = vld [vmem:[%s3187_s13 + $0x140] sm:$0xff]  ;;  %v3365_v51 = vld [vmem:[%s3187_s13 + $0x78] sm:$0xff] }
  0x2b   : > { %4492 = vst [vmem:[#allocation18_spill] sm:$0xff] %v3315_v62  ;;  %2648 = vmatprep.subr.msk.bf16.mxu0 %vm3209_vm2, %v3315_v62  ;;  %v3354_v42 = vpack.c.bf16 %v389_v6, %v387_v63  ;;  %v435_v45 = vrot.slane %v3324_v14, 1  ;;  %v3362_v47 = vld [vmem:[%s3187_s13 + $0x148] sm:$0x3]  ;;  %v3367_v52 = vpack.c.bf16 %v434_v32, %v432_v16  ;;  %v436_v57 = vrot.slane %v3333_v22, 1  ;;  %v3373_v59 = vld [vmem:[%s3187_s13 + $0x80] sm:$0xff] }
  0x2c   : > { %v392_v44 = vsel %vm374_vm1, %v390_v12, %v391_v13  ;;  %v394_v53 = vsel %vm374_vm1, %v391_v13, %v393_v21  ;;  %v438_v58 = vrot.slane %v3336_v23, 1  ;;  %v3376_v63 = vld [vmem:[%s3187_s13 + $0x88] sm:$0x3]  ;;  %v395_v5 = vrot.slane %v3339_v27, 1  ;;  %v3397_v28 = vld [vmem:[%s3187_s13 + $0x150] sm:$0xff]  ;;  %v3400_v31 = vld [vmem:[%s3187_s13 + $0x158] sm:$0xff] }
  0x2d   : > { %4493 = vst [vmem:[#allocation19_spill] sm:$0xff] %v3354_v42  ;;  %4494 = vst [vmem:[#allocation20_spill] sm:$0xff] %v3367_v52  ;;  %v396_v6 = vrot.slane %v3345_v35, 1  ;;  %v398_v7 = vrot.slane %v3348_v36, 1  ;;  %v440_v12 = vrot.slane %v3351_v37, 1  ;;  %v441_v16 = vrot.slane %v3359_v46, 1 }
  0x2e   : > { %v400_v21 = vrot.slane %v3365_v51, 1  ;;  %v401_v32 = vrot.slane %v3373_v59, 1  ;;  %v403_v41 = vrot.slane %v3376_v63, 1  ;;  %4495 = vst [vmem:[#allocation21_spill] sm:$0xff] %v3397_v28  ;;  %4496 = vst [vmem:[#allocation22_spill] sm:$0xff] %v3400_v31  ;;  %v757_v56 = vrot.slane %v3239_v25, 2 }
  0x2f   : > { %v3403_v15 = vld [vmem:[%s3187_s13 + $0x160] sm:$0x3]  ;;  %v3409_v61 = vpack.c.bf16 %v394_v53, %v392_v44  ;;  %v437_v13 = vsel %vm374_vm1, %v435_v45, %v436_v57  ;;  %v439_v30 = vsel %vm374_vm1, %v436_v57, %v438_v58  ;;  %v3417_v1 = vld [vmem:[%s3187_s13 + $0x98] sm:$0xff]  ;;  %v397_v20 = vsel %vm374_vm1, %v395_v5, %v396_v6  ;;  %v3431_v19 = vld [vmem:[%s3187_s13 + $0x168] sm:$0xff] }
  0x30   : > { %2459 = vmatpush3.bf16.xpose.msk.msra.mxu1 %vm3209_vm2, %v2457_v50  ;;  %v443_v50 = vrot.slane %v3362_v47, 1  ;;  %4498 = vst [vmem:[#allocation24_spill] sm:$0xff] %v3417_v1  ;;  %v3420_v0 = vld [vmem:[%s3187_s13 + $0xa0] sm:$0x3]  ;;  %v399_v34 = vsel %vm374_vm1, %v396_v6, %v398_v7  ;;  %v442_v11 = vsel %vm374_vm1, %v440_v12, %v441_v16  ;;  %v402_v53 = vsel %vm374_vm1, %v400_v21, %v401_v32  ;;  %v3434_v4 = vld [vmem:[%s3187_s13 + $0x170] sm:$0xff] }
  0x31   : > { %2462 = vmatprep.subr.msk.bf16.mxu1 %vm3209_vm2, %v3315_v62  ;;  %2651 = vmatpush3.bf16.xpose.msk.msra.mxu0 %vm3209_vm2, %v3354_v42  ;;  %v3414_v62 = vld [vmem:[%s3187_s13 + $0x90] sm:$0xff]  ;;  %v404_v45 = vsel %vm374_vm1, %v401_v32, %v403_v41  ;;  %v445_v57 = vrot.slane %v3397_v28, 1  ;;  %v446_v58 = vrot.slane %v3400_v31, 1  ;;  %4499 = vst [vmem:[#allocation25_spill] sm:$0xff] %v3431_v19  ;;  %4500 = vst [vmem:[#allocation26_spill] sm:$0xff] %v3434_v4  ;;  %v448_v6 = vrot.slane %v3403_v15, 1 }
  0x32   : > { %2654 = vmatprep.subr.msk.bf16.mxu0 %vm3209_vm2, %v3367_v52  ;;  %4497 = vst [vmem:[#allocation23_spill] sm:$0xff] %v3414_v62  ;;  %v444_v44 = vsel %vm374_vm1, %v441_v16, %v443_v50  ;;  %v3437_v5 = vld [vmem:[%s3187_s13 + $0x178] sm:$0x3]  ;;  %v405_v7 = vrot.slane %v3414_v62, 1  ;;  %v406_v12 = vrot.slane %v3417_v1, 1  ;;  %v408_v16 = vrot.slane %v3420_v0, 1 }
  0x33   : > { %4501 = vst [vmem:[#allocation27_spill] sm:$0xff] %v3437_v5  ;;  %v759_v41 = vrot.slane %v3242_v26, 2  ;;  %v764_v50 = vrot.slane %v3272_v40, 2  ;;  %v3446_v32 = vpack.c.bf16 %v439_v30, %v437_v13  ;;  %v3449_v31 = vld [vmem:[%s3187_s13 + $0xa8] sm:$0xff]  ;;  %v3452_v28 = vld [vmem:[%s3187_s13 + $0xb0] sm:$0xff]  ;;  %v450_v26 = vrot.slane %v3431_v19, 1 }
  0x34   : > { %4502 = vst [vmem:[#allocation28_spill] sm:$0xff] %v3449_v31  ;;  %4503 = vst [vmem:[#allocation29_spill] sm:$0xff] %v3452_v28  ;;  %v451_v40 = vrot.slane %v3434_v4, 1  ;;  %v453_v21 = vrot.slane %v3437_v5, 1  ;;  %v3462_v30 = vld [vmem:[%s3187_s13 + $0xb8] sm:$0x3]  ;;  %v3467_v13 = vpack.c.bf16 %v399_v34, %v397_v20  ;;  %v3471_v62 = vpack.c.bf16 %v404_v45, %v402_v53 }
  0x35   : > { %v447_v5 = vsel %vm374_vm1, %v445_v57, %v446_v58  ;;  %v449_v4 = vsel %vm374_vm1, %v446_v58, %v448_v6  ;;  %v407_v19 = vsel %vm374_vm1, %v405_v7, %v406_v12  ;;  %v3482_v20 = vld [vmem:[%s3187_s13 + $0x180] sm:$0xff]  ;;  %v410_v34 = vrot.slane %v3449_v31, 1  ;;  %v3494_v45 = vld [vmem:[%s3187_s13 + $0x190] sm:$0x3] }
  0x36   : > { %v413_v53 = vrot.slane %v3462_v30, 1  ;;  %v3498_v57 = vpack.c.bf16 %v3193_v3, %v3190_v2  ;;  %v452_v58 = vsel %vm374_vm1, %v450_v26, %v451_v40  ;;  %v454_v6 = vsel %vm374_vm1, %v451_v40, %v453_v21 }
  0x37   : > { %v1076_v1 = vrot.slane %v3482_v20, 1  ;;  %v760_v31 = vsel %vm750_vm3, %v757_v56, %v759_v41  ;;  %v3514_v26 = vpack.c.bf16 %v449_v4, %v447_v5  ;;  %v784_v21 = vrot.slane %v3420_v0, 2 }
  0x38   : > { %2465 = vmatpush3.bf16.xpose.msk.msra.mxu1 %vm3209_vm2, %v3354_v42  ;;  %v3469_v42 = vpack.c.bf16 %v444_v44, %v442_v11  ;;  %v3485_v11 = vld [vmem:[%s3187_s13 + $0x188] sm:$0xff]  ;;  %v411_v44 = vrot.slane %v3452_v28, 1  ;;  %4504 = vst [vmem:[#allocation30_spill] sm:$0xff] %v3498_v57  ;;  %v3512_v57 = vpack.c.bf16 %v3205_v9, %v3202_v8  ;;  %v1079_v40 = vrot.slane %v3494_v45, 1 }
  0x39   : > { %2468 = vmatprep.subr.msk.bf16.mxu1 %vm3209_vm2, %v3367_v52  ;;  %2657 = vmatpush3.bf16.xpose.msk.msra.mxu0 %vm3209_vm2, %v3409_v61  ;;  %v409_v52 = vsel %vm374_vm1, %v406_v12, %v408_v16  ;;  %v4505_v12 = vrot.slane %v3236_v24, 2  ;;  %v1077_v28 = vrot.slane %v3485_v11, 1  ;;  %4506 = vst [vmem:[#allocation31_spill] sm:$0xff] %v3514_v26  ;;  %v3533_v4 = vpack.c.bf16 %v3239_v25, %v3236_v24 }
  0x3a   : > { %2660 = vmatprep.subr.msk.bf16.mxu0 %vm3209_vm2, %v3446_v32  ;;  %v3520_v17 = vpack.c.bf16 %v409_v52, %v407_v19  ;;  %v3525_v18 = vsel %vm374_vm1, %v410_v34, %v411_v44  ;;  %v762_v19 = vrot.slane %v3269_v39, 2  ;;  %v3539_v52 = vpack.c.bf16 %v3257_v33, %v3247_v29 }
  0x3b   : > { %v758_v16 = vsel %vm750_vm3, %v4505_v12, %v757_v56  ;;  %v3522_v12 = vpack.c.bf16 %v454_v6, %v452_v58  ;;  %v789_v56 = vrot.slane %v3462_v30, 2  ;;  %v3545_v5 = vsel %vm374_vm1, %v411_v44, %v413_v53 }
  0x3c   : > { %v3518_v7 = vpack.c.bf16 %v760_v31, %v758_v16  ;;  %v761_v31 = vrot.slane %v3266_v38, 2  ;;  %v3548_v41 = vsel %vm374_vm1, %v1076_v1, %v1077_v28  ;;  %v806_v24 = vrot.slane %v3279_v43, 2 }
  0x3d   : > { %v807_v25 = vrot.slane %v3286_v48, 2  ;;  %v3556_v34 = vsel %vm374_vm1, %v1077_v28, %v1079_v40  ;;  %v765_v6 = vsel %vm750_vm3, %v762_v19, %v764_v50  ;;  %v809_v44 = vrot.slane %v3289_v49, 2 }
  0x3e   : > { %v763_v58 = vsel %vm750_vm3, %v761_v31, %v762_v19  ;;  %v3569_v16 = vpack.c.bf16 %v3269_v39, %v3266_v38  ;;  %v766_v28 = vrot.slane %v3297_v54, 2  ;;  %v767_v50 = vrot.slane %v3300_v55, 2 }
  0x3f   : > { %v3564_v1 = vpack.c.bf16 %v765_v6, %v763_v58  ;;  %v808_v53 = vsel %vm750_vm3, %v806_v24, %v807_v25  ;;  %v810_v40 = vsel %vm750_vm3, %v807_v25, %v809_v44  ;;  %v3576_v49 = vpack.c.bf16 %v3286_v48, %v3279_v43 }
  0x40   : > { %2471 = vmatpush3.bf16.xpose.msk.msra.mxu1 %vm3209_vm2, %v3409_v61  ;;  %v811_v31 = vrot.slane %v3324_v14, 2  ;;  %v3579_v19 = vpack.c.bf16 %v810_v40, %v808_v53  ;;  %v812_v24 = vrot.slane %v3333_v22, 2  ;;  %v814_v58 = vrot.slane %v3336_v23, 2 }
  0x41   : > { %2474 = vmatprep.subr.msk.bf16.mxu1 %vm3209_vm2, %v3446_v32  ;;  %2663 = vmatpush3.bf16.xpose.msk.msra.mxu0 %vm3209_vm2, %v3467_v13  ;;  %v3585_v38 = vpack.c.bf16 %v3300_v55, %v3297_v54  ;;  %v768_v39 = vsel %vm750_vm3, %v766_v28, %v767_v50  ;;  %v4507_v25 = vrot.slane %v3310_v60, 2  ;;  %v771_v43 = vrot.slane %v3339_v27, 2 }
  0x42   : > { %2666 = vmatprep.subr.msk.bf16.mxu0 %vm3209_vm2, %v3469_v42  ;;  %v772_v48 = vrot.slane %v3345_v35, 2  ;;  %v813_v53 = vsel %vm750_vm3, %v811_v31, %v812_v24  ;;  %v815_v23 = vsel %vm750_vm3, %v812_v24, %v814_v58  ;;  %v3599_v54 = vpack.c.bf16 %v3333_v22, %v3324_v14 }
  0x43   : > { %v770_v6 = vsel %vm750_vm3, %v767_v50, %v4507_v25  ;;  %v3604_v55 = vpack.c.bf16 %v815_v23, %v813_v53  ;;  %v4508_v28 = vrot.slane %v3348_v36, 2  ;;  %v816_v50 = vrot.slane %v3351_v37, 2  ;;  %v4509_v25 = vld [vmem:[#allocation21_spill] sm:$0xff] }
  0x44   : > { %v3593_v44 = vpack.c.bf16 %v770_v6, %v768_v39  ;;  %v773_v60 = vsel %vm750_vm3, %v771_v43, %v772_v48  ;;  %v817_v22 = vrot.slane %v3359_v46, 2  ;;  %v819_v31 = vrot.slane %v3362_v47, 2  ;;  %v4510_v47 = vld [vmem:[#allocation22_spill] sm:$0xff] }
  0x45   : > { %v775_v40 = vsel %vm750_vm3, %v772_v48, %v4508_v28  ;;  %v3620_v24 = vpack.c.bf16 %v3345_v35, %v3339_v27  ;;  %v776_v36 = vrot.slane %v3365_v51, 2  ;;  %v777_v58 = vrot.slane %v3373_v59, 2 }
  0x46   : > { %v3614_v14 = vpack.c.bf16 %v775_v40, %v773_v60  ;;  %v3629_v39 = vpack.c.bf16 %v3359_v46, %v3351_v37  ;;  %v821_v6 = vrot.slane %v4509_v25, 2  ;;  %v818_v27 = vsel %vm750_vm3, %v816_v50, %v817_v22 }
  0x47   : > { %v820_v35 = vsel %vm750_vm3, %v817_v22, %v819_v31  ;;  %v822_v43 = vrot.slane %v4510_v47, 2  ;;  %v824_v48 = vrot.slane %v3403_v15, 2  ;;  %v778_v23 = vsel %vm750_vm3, %v776_v36, %v777_v58  ;;  %v4512_v22 = vld [vmem:[#allocation23_spill] sm:$0xff] }
  0x48   : > { %2477 = vmatpush3.bf16.xpose.msk.msra.mxu1 %vm3209_vm2, %v3467_v13  ;;  %v3639_v53 = vpack.c.bf16 %v820_v35, %v818_v27  ;;  %v4511_v37 = vrot.slane %v3376_v63, 2  ;;  %v3647_v60 = vpack.c.bf16 %v3373_v59, %v3365_v51  ;;  %v781_v15 = vrot.slane %v4512_v22, 2  ;;  %v4513_v27 = vld [vmem:[#allocation24_spill] sm:$0xff]  ;;  %v4515_v51 = vld [vmem:[#allocation26_spill] sm:$0xff] }
  0x49   : > { %2480 = vmatprep.subr.msk.bf16.mxu1 %vm3209_vm2, %v3469_v42  ;;  %2669 = vmatpush3.bf16.xpose.msk.msra.mxu0 %vm3209_vm2, %v3471_v62  ;;  %v823_v40 = vsel %vm750_vm3, %v821_v6, %v822_v43  ;;  %v825_v50 = vsel %vm750_vm3, %v822_v43, %v824_v48  ;;  %v782_v36 = vrot.slane %v4513_v27, 2  ;;  %v3659_v63 = vpack.c.bf16 %v4510_v47, %v4509_v25  ;;  %v4517_v43 = vld [vmem:[#allocation28_spill] sm:$0xff]  ;;  %v4518_v47 = vld [vmem:[#allocation29_spill] sm:$0xff] }
  0x4a   : > { %2672 = vmatprep.subr.msk.bf16.mxu0 %vm3209_vm2, %v3514_v26  ;;  %v780_v46 = vsel %vm750_vm3, %v777_v58, %v4511_v37  ;;  %v3654_v31 = vpack.c.bf16 %v825_v50, %v823_v40  ;;  %v4514_v58 = vld [vmem:[#allocation25_spill] sm:$0xff]  ;;  %v827_v59 = vrot.slane %v4515_v51, 2  ;;  %v3666_v6 = vpack.c.bf16 %v4513_v27, %v4512_v22 }
  0x4b   : > { %v3649_v28 = vpack.c.bf16 %v780_v46, %v778_v23  ;;  %v826_v35 = vrot.slane %v4514_v58, 2  ;;  %v4516_v23 = vld [vmem:[#allocation27_spill] sm:$0xff]  ;;  %v786_v48 = vrot.slane %v4517_v43, 2  ;;  %v783_v46 = vsel %vm750_vm3, %v781_v15, %v782_v36 }
  0x4c   : > { %v829_v37 = vrot.slane %v4516_v23, 2  ;;  %v785_v25 = vsel %vm750_vm3, %v782_v36, %v784_v21  ;;  %v787_v40 = vrot.slane %v4518_v47, 2  ;;  %v3679_v50 = vpack.c.bf16 %v4515_v51, %v4514_v58 }
  0x4d   : > { %v3684_v22 = vpack.c.bf16 %v785_v25, %v783_v46  ;;  %v828_v27 = vsel %vm750_vm3, %v826_v35, %v827_v59  ;;  %v1172_v0 = vrot.slane %v3482_v20, 2  ;;  %v1173_v51 = vrot.slane %v3485_v11, 2  ;;  %v4521_v46 = vld [vmem:[#allocation10_spill] sm:$0xff] }
  0x4e   : > { %v830_v15 = vsel %vm750_vm3, %v827_v59, %v829_v37  ;;  %v788_v36 = vsel %vm750_vm3, %v786_v48, %v787_v40  ;;  %v790_v58 = vsel %vm750_vm3, %v787_v40, %v789_v56  ;;  %v1175_v59 = vrot.slane %v3494_v45, 2 }
  0x4f   : > { %v3692_v21 = vpack.c.bf16 %v830_v15, %v828_v27  ;;  %v3702_v35 = vpack.c.bf16 %v790_v58, %v788_v36  ;;  %v3707_v23 = vpack.c.bf16 %v4518_v47, %v4517_v43  ;;  %v4519_v37 = vrot.slane %v3193_v3, 2  ;;  %v4524_v15 = vld [vmem:[#allocation13_spill] sm:$0xff]  ;;  %v4526_v36 = vld [vmem:[#allocation12_spill] sm:$0xff]  ;;  %v4528_v47 = vld [vmem:[#allocation14_spill] sm:$0xff] }
  0x50   : > { %2483 = vmatpush3.bf16.xpose.msk.msra.mxu1 %vm3209_vm2, %v3471_v62  ;;  %v4520_v30 = vrot.slane %v3190_v2, 2  ;;  %v1174_v48 = vsel %vm750_vm3, %v1172_v0, %v1173_v51  ;;  %v4522_v25 = vrot.slane %v4521_v46, 2  ;;  %v4525_v45 = vrot.slane %v4524_v15, 2 }
  0x51   : > { %2486 = vmatprep.subr.msk.bf16.mxu1 %vm3209_vm2, %v3514_v26  ;;  %2675 = vmatpush3.bf16.xpose.msk.msra.mxu0 %vm3209_vm2, %v3520_v17  ;;  %v4523_v40 = vmov %v4519_v37  ;;  %v4527_v58 = vrot.slane %v4526_v36, 2  ;;  %v4529_v26 = vrot.slane %v4528_v47, 2  ;;  %v1176_v0 = vsel %vm750_vm3, %v1173_v51, %v1175_v59  ;;  %v4531_v51 = vld [vmem:[#allocation11_spill] sm:$0xff] }
  0x52   : > { %2678 = vmatprep.subr.msk.bf16.mxu0 %vm3209_vm2, %v3522_v12  ;;  %v793_v56 = vsel %vm750_vm3, %v4520_v30, %v4519_v37  ;;  %v795_v27 = vsel %vm750_vm3, %v4523_v40, %v4522_v25  ;;  %v4530_v2 = vmov %v4525_v45  ;;  %v3741_v46 = vpack.c.bf16 %v3485_v11, %v3482_v20 }
  0x53   : > { %v3725_v43 = vsel %vm750_vm3, %v4527_v58, %v4525_v45  ;;  %v3732_v37 = vsel %vm750_vm3, %v4530_v2, %v4529_v26  ;;  %v3735_v30 = vpack.c.bf16 %v795_v27, %v793_v56  ;;  %v3745_v25 = vpack.c.bf16 %v3545_v5, %v3525_v18  ;;  %v4534_v27 = vld [vmem:[#allocation15_spill] sm:$0xff]  ;;  %v4535_v58 = vld [vmem:[#allocation8_spill] sm:$0xff]  ;;  %v317_v2 = vld [vmem:[%s4439_s2 + $0x48] sm:$0x1] }
  0x54   : > { %v2547_v3 = vpack.c.bf16 %v3732_v37, %v3725_v43  ;;  %v3747_v40 = vpack.c.bf16 %v1176_v0, %v1174_v48  ;;  %v3751_v26 = vpack.c.bf16 %v3556_v34, %v3548_v41  ;;  %v799_v59 = vrot.slane %v4531_v51, 2  ;;  %v4532_v41 = vld [vmem:[#allocation17_spill] sm:$0xff]  ;;  %v4533_v48 = vld [vmem:[#allocation30_spill] sm:$0xff]  ;;  %v320_v43 = vld [vmem:[%s4439_s2 + $0x60] sm:$0xff] }
  0x55   : > { %v796_v56 = vrot.slane %v3202_v8, 2  ;;  %v797_v20 = vrot.slane %v3205_v9, 2  ;;  %v801_v8 = vrot.slane %v3247_v29, 2  ;;  %v802_v9 = vrot.slane %v3257_v33, 2  ;;  %v311_v33 = vld [vmem:[%s4439_s2 + $0x18] sm:$0x1] }
  0x56   : > { %v804_v34 = vrot.slane %v4532_v41, 2  ;;  %v4536_v0 = vpack.c.bf16 %v4524_v15, %v4526_v36  ;;  %v4537_v51 = vld [vmem:[#allocation9_spill] sm:$0xff]  ;;  %v318_v15 = vld [vmem:[%s4439_s2 + $0x50] sm:$0xff]  ;;  %v4009_v37 = vld [vmem:[%s3187_s13 + $0x1a0] sm:$0xff] }
  0x57   : > { %v798_v18 = vsel %vm750_vm3, %v796_v56, %v797_v20  ;;  %v800_v11 = vsel %vm750_vm3, %v797_v20, %v799_v59  ;;  %v803_v45 = vsel %vm750_vm3, %v801_v8, %v802_v9  ;;  %v308_v59 = vld [vmem:[%s4439_s2] sm:$0xff]  ;;  %v309_v36 = vld [vmem:[%s4439_s2 + $0x8] sm:$0x1]  ;;  %v319_v56 = vld [vmem:[%s4439_s2 + $0x58] sm:$0x1] }
  0x58   : > { %2489 = vmatpush3.bf16.xpose.msk.msra.mxu1 %vm3209_vm2, %v3520_v17  ;;  %v3770_v5 = vpack.c.bf16 %v800_v11, %v798_v18  ;;  %v805_v29 = vsel %vm750_vm3, %v802_v9, %v804_v34  ;;  %v312_v20 = vld [vmem:[%s4439_s2 + $0x20] sm:$0xff]  ;;  %v1459_v18 = vrot.slane %v4009_v37, 2  ;;  %v4022_v8 = vld [vmem:[%s3187_s13 + $0x1a8] sm:$0x3] }
  0x59   : > { %2492 = vmatprep.subr.msk.bf16.mxu1 %vm3209_vm2, %v3522_v12  ;;  %2681 = vmatpush3.bf16.xpose.msk.msra.mxu0 %vm3209_vm2, %v3745_v25  ;;  %v3794_v47 = vpack.c.bf16 %v805_v29, %v803_v45  ;;  %v1461_v41 = vrot.slane %v4022_v8, 2  ;;  %v4538_v29 = vld [vmem:[#allocation18_spill] sm:$0xff] }
  0x5a   : > { %2684 = vmatprep.subr.msk.bf16.mxu0 %vm3209_vm2, %v3751_v26 }
  0x5b   : > { %v1462_v34 = vsel %vm750_vm3, %v1459_v18, %v1461_v41 }
  0x60   : > { %2495 = vmatpush3.bf16.xpose.msk.msra.mxu1 %vm3209_vm2, %v3745_v25 }
  0x61   : > { %2498 = vmatprep.subr.msk.bf16.mxu1 %vm3209_vm2, %v4533_v48  ;;  %2687 = vmatpush3.bf16.xpose.msk.msra.mxu0 %vm3209_vm2, %v4534_v27 }
  0x62   : > { %2690 = vmatprep.subr.msk.bf16.mxu0 %vm3209_vm2, %v3770_v5 }
  0x67   : > { %2157 = vmatmul.mubr.msk.f32.vlgmr.msra.gmra.mrb[0].mxu1 %vm455_vm0, %v4535_v58  ;;  %v321_v58 = vld [vmem:[%s4439_s2 + $0x68] sm:$0x1] }
  0x68   : > { %2501 = vmatpush3.bf16.xpose.msk.msra.mxu1 %vm3209_vm2, %v4536_v0  ;;  %2158 = vmatprep.mubr.msk.f32.mxu1 %vm455_vm0, %v311_v33  ;;  %v4085_v0 = vld [vmem:[%s253_s9] sm:$0xff] }
  0x69   : > { %2301 = vmatmul.mubr.msk.f32.vlgmr.msra.gmra.mrb[0].mxu0 %vm455_vm0, %v4537_v51  ;;  %2504 = vmatprep.subr.msk.bf16.mxu1 %vm3209_vm2, %v3512_v57  ;;  %v3080_v51 = vmov 0  }
  0x6a   : > { %2693 = vmatpush3.bf16.xpose.msk.msra.mxu0 %vm3209_vm2, %v3518_v7  ;;  %2302 = vmatprep.mubr.msk.f32.mxu0 %vm455_vm0, %v317_v2 }
  0x6b   : > { %2696 = vmatprep.subr.msk.bf16.mxu0 %vm3209_vm2, %v3794_v47  ;;  %2159 = vmatmul.mubr.msk.f32.gmra.mrb[2].mxu1 %vm455_vm0, %v311_v33  ;;  %v313_v33 = vld [vmem:[%s4439_s2 + $0x28] sm:$0x1] }
  0x6c   : > { %2192 = vmatprep.mubr.msk.f32.mxu1 %vm455_vm0, %v308_v59  ;;  %2979 = vset.pattern.permute.xlu0 %v3080_v51 }
  0x6d   : > { %2303 = vmatmul.mubr.msk.f32.gmra.mrb[2].mxu0 %vm455_vm0, %v317_v2  ;;  %v4539_v2 = vld [vmem:[#allocation19_spill] sm:$0xff]  ;;  %1591 = vrot.lane.b32.xlu0 %v4085_v0, %s3081_s11 }
  0x6e   : > { %2336 = vmatprep.mubr.msk.f32.mxu0 %vm455_vm0, %v318_v15  ;;  %1599 = vrot.lane.b32.xlu1 %v4085_v0, %s3082_s12 }
  0x70   : > { %2507 = vmatpush3.bf16.xpose.msk.msra.mxu1 %vm3209_vm2, %v3533_v4 }
  0x71   : > { %2510 = vmatprep.subr.msk.bf16.mxu1 %vm3209_vm2, %v3539_v52 }
  0x72   : > { %2699 = vmatpush3.bf16.xpose.msk.msra.mxu0 %vm3209_vm2, %v3564_v1 }
  0x73   : > { %2702 = vmatprep.subr.msk.bf16.mxu0 %vm3209_vm2, %v3579_v19 }
  0x78   : > { %2513 = vmatpush3.bf16.xpose.msk.msra.mxu1 %vm3209_vm2, %v3569_v16 }
  0x79   : > { %2516 = vmatprep.subr.msk.bf16.mxu1 %vm3209_vm2, %v3576_v49 }
  0x7a   : > { %2705 = vmatpush3.bf16.xpose.msk.msra.mxu0 %vm3209_vm2, %v3593_v44 }
  0x7b   : > { %2708 = vmatprep.subr.msk.bf16.mxu0 %vm3209_vm2, %v3604_v55 }
  0x80   : > { %2519 = vmatpush3.bf16.xpose.msk.msra.mxu1 %vm3209_vm2, %v3585_v38 }
  0x81   : > { %2522 = vmatprep.subr.msk.bf16.mxu1 %vm3209_vm2, %v3599_v54 }
  0x82   : > { %2711 = vmatpush3.bf16.xpose.msk.msra.mxu0 %vm3209_vm2, %v3614_v14 }
  0x83   : > { %2714 = vmatprep.subr.msk.bf16.mxu0 %vm3209_vm2, %v3639_v53 }
  0x88   : > { %2525 = vmatpush3.bf16.xpose.msk.msra.mxu1 %vm3209_vm2, %v3620_v24 }
  0x89   : > { %2528 = vmatprep.subr.msk.bf16.mxu1 %vm3209_vm2, %v3629_v39 }
  0x8a   : > { %2717 = vmatpush3.bf16.xpose.msk.msra.mxu0 %vm3209_vm2, %v3649_v28 }
  0x8b   : > { %2720 = vmatprep.subr.msk.bf16.mxu0 %vm3209_vm2, %v3654_v31 }
  0x90   : > { %2531 = vmatpush3.bf16.xpose.msk.msra.mxu1 %vm3209_vm2, %v3647_v60 }
  0x91   : > { %2534 = vmatprep.subr.msk.bf16.mxu1 %vm3209_vm2, %v3659_v63 }
  0x92   : > { %2723 = vmatpush3.bf16.xpose.msk.msra.mxu0 %vm3209_vm2, %v3684_v22 }
  0x93   : > { %2726 = vmatprep.subr.msk.bf16.mxu0 %vm3209_vm2, %v3692_v21 }
  0x98   : > { %2537 = vmatpush3.bf16.xpose.msk.msra.mxu1 %vm3209_vm2, %v3666_v6 }
  0x99   : > { %2540 = vmatprep.subr.msk.bf16.mxu1 %vm3209_vm2, %v3679_v50 }
  0x9a   : > { %2729 = vmatpush3.bf16.xpose.msk.msra.mxu0 %vm3209_vm2, %v3702_v35 }
  0x9b   : > { %2732 = vmatprep.subr.msk.bf16.mxu0 %vm3209_vm2, %v3747_v40 }
  0xa0   : > { %2543 = vmatpush3.bf16.xpose.msk.msra.mxu1 %vm3209_vm2, %v3707_v23 }
  0xa1   : > { %2546 = vmatprep.subr.msk.bf16.mxu1 %vm3209_vm2, %v3735_v30 }
  0xa2   : > { %2735 = vmatpush3.bf16.xpose.msk.msra.mxu0 %vm3209_vm2, %v3735_v30 }
  0xa3   : > { %2738 = vmatprep.subr.msk.bf16.mxu0 %vm3209_vm2, %v3539_v52 }
  0xa7   : > { %2193 = vmatmul.mubr.msk.f32.vlgmr.msra.gmra.mrb[0].mxu1 %vm455_vm0, %v308_v59  ;;  %v4092_v59 = vld [vmem:[%s253_s9 + $0x8] sm:$0xff] }
  0xa8   : > { %2549 = vmatpush3.bf16.xpose.msk.msra.mxu1 %vm3209_vm2, %v2547_v3  ;;  %2194 = vmatprep.mubr.msk.f32.mxu1 %vm455_vm0, %v309_v36 }
  0xa9   : > { %2337 = vmatmul.mubr.msk.f32.vlgmr.msra.gmra.mrb[0].mxu0 %vm455_vm0, %v318_v15  ;;  %2552 = vmatprep.subr.msk.bf16.mxu1 %vm3209_vm2, %v3770_v5  ;;  %v1608_v15 = vrot.slane %v4085_v0, 1 }
  0xaa   : > { %2741 = vmatpush3.bf16.xpose.msk.msra.mxu0 %vm3209_vm2, %v3569_v16  ;;  %2338 = vmatprep.mubr.msk.f32.mxu0 %vm455_vm0, %v319_v56 }
  0xab   : > { %2744 = vmatprep.subr.msk.bf16.mxu0 %vm3209_vm2, %v3576_v49  ;;  %2195 = vmatmul.mubr.msk.f32.gmra.mrb[2].mxu1 %vm455_vm0, %v309_v36  ;;  %v1609_v36 = vrot.slane %v4092_v59, 1 }
  0xac   : > { %2228 = vmatprep.mubr.msk.f32.mxu1 %vm455_vm0, %v312_v20  ;;  %1593 = vrot.lane.b32.xlu0 %v4092_v59, %s3081_s11 }
  0xad   : > { %2339 = vmatmul.mubr.msk.f32.gmra.mrb[2].mxu0 %vm455_vm0, %v319_v56  ;;  %v1588_v56 = vld [vmem:[%s253_s9 + $0x10] sm:$0x3]  ;;  %1601 = vrot.lane.b32.xlu1 %v4092_v59, %s3082_s12  ;;  %s1694_s9 = sshll.u32 %s243_s10, 4  ;;  %s4352_s9 = int_to_ptr.vmem [resolvable:$true] %s1694_s9 }
  0xae   : > { %2372 = vmatprep.mubr.msk.f32.mxu0 %vm455_vm0, %v320_v43  ;;  %s2984_s16 = scalar_lea.vmem %s4352_s9, 256  ;;  %p2991_p0 = scmp.lt.s32.totalorder %s4352_s9, %s2989_s23 }
  0xaf   : > { %p2985_p11 = scmp.ne.s32.totalorder %s4352_s9, %s2984_s16  ;;  %p2992_p1 = scmp.lt.s32.totalorder %s2990_s25, %s2984_s16 }
  0xb0   : > { %2555 = vmatpush3.bf16.xpose.msk.msra.mxu1 %vm3209_vm2, %v3518_v7  ;;  %v4006_v7 = vld [vmem:[%s3187_s13 + $0x198] sm:$0xff]  ;;  %s1667_s13 = scalar_lea.sflag [#allocation5], %s4345_s7 }
  0xb1   : > { %2558 = vmatprep.subr.msk.bf16.mxu1 %vm3209_vm2, %v3794_v47  ;;  %v1458_v3 = vrot.slane %v4006_v7, 2  ;;  %v2778_v11 = vpack.c.bf16 %v4009_v37, %v4006_v7  ;;  %p2986_p12 = pnand %p2985_p11, %p3155_p5  ;;  %p2993_p2 = por %p2992_p1, %p2991_p0 }
  0xb2   : > { %2747 = vmatpush3.bf16.xpose.msk.msra.mxu0 %vm3209_vm2, %v3585_v38 }
  0xb3   : > { %2750 = vmatprep.subr.msk.bf16.mxu0 %vm3209_vm2, %v3599_v54  ;;  %v1460_v9 = vsel %vm750_vm3, %v1458_v3, %v1459_v18  ;;  %p2987_p13 = pneg %p2986_p12 }
  0xb4   : > { %v4032_v45 = vpack.c.bf16 %v1462_v34, %v1460_v9 }
  0xb5   : > { %p2994_p3 = pnand %p2993_p2, %p2987_p13 }
  0xb8   : > { %2561 = vmatpush3.bf16.xpose.msk.msra.mxu1 %vm3209_vm2, %v3564_v1 }
  0xb9   : > { %2564 = vmatprep.subr.msk.bf16.mxu1 %vm3209_vm2, %v3579_v19 }
  0xba   : > { %2753 = vmatpush3.bf16.xpose.msk.msra.mxu0 %vm3209_vm2, %v3620_v24 }
  0xbb   : > { %2756 = vmatprep.subr.msk.bf16.mxu0 %vm3209_vm2, %v3629_v39 }
  0xc0   : > { %2567 = vmatpush3.bf16.xpose.msk.msra.mxu1 %vm3209_vm2, %v3593_v44 }
  0xc1   : > { %2570 = vmatprep.subr.msk.bf16.mxu1 %vm3209_vm2, %v3604_v55 }
  0xc2   : > { %2759 = vmatpush3.bf16.xpose.msk.msra.mxu0 %vm3209_vm2, %v3647_v60 }
  0xc3   : > { %2762 = vmatprep.subr.msk.bf16.mxu0 %vm3209_vm2, %v3659_v63 }
  0xc8   : > { %2573 = vmatpush3.bf16.xpose.msk.msra.mxu1 %vm3209_vm2, %v3614_v14 }
  0xc9   : > { %2576 = vmatprep.subr.msk.bf16.mxu1 %vm3209_vm2, %v3639_v53 }
  0xca   : > { %2765 = vmatpush3.bf16.xpose.msk.msra.mxu0 %vm3209_vm2, %v3666_v6 }
  0xcb   : > { %2768 = vmatprep.subr.msk.bf16.mxu0 %vm3209_vm2, %v3679_v50 }
  0xd0   : > { %2579 = vmatpush3.bf16.xpose.msk.msra.mxu1 %vm3209_vm2, %v3649_v28 }
  0xd1   : > { %2582 = vmatprep.subr.msk.bf16.mxu1 %vm3209_vm2, %v3654_v31 }
  0xd2   : > { %2771 = vmatpush3.bf16.xpose.msk.msra.mxu0 %vm3209_vm2, %v3707_v23 }
  0xd3   : > { %2774 = vmatprep.subr.msk.bf16.mxu0 %vm3209_vm2, %v3741_v46 }
  0xd8   : > { %2585 = vmatpush3.bf16.xpose.msk.msra.mxu1 %vm3209_vm2, %v3684_v22 }
  0xd9   : > { %2588 = vmatprep.subr.msk.bf16.mxu1 %vm3209_vm2, %v3692_v21 }
  0xda   : > { %2777 = vmatpush3.bf16.xpose.msk.msra.mxu0 %vm3209_vm2, %v4533_v48 }
  0xdb   : > { %2780 = vmatprep.subr.msk.bf16.mxu0 %vm3209_vm2, %v2778_v11 }
  0xe0   : > { %2591 = vmatpush3.bf16.xpose.msk.msra.mxu1 %vm3209_vm2, %v3702_v35 }
  0xe1   : > { %2594 = vmatprep.subr.msk.bf16.mxu1 %vm3209_vm2, %v3512_v57 }
  0xe2   : > { %2783 = vmatpush3.bf16.xpose.msk.msra.mxu0 %vm3209_vm2, %v3512_v57  ;;  %v4064_v57 = vld [vmem:[%s4439_s2 + $0x30] sm:$0xff] }
  0xe3   : > { %2786 = vmatprep.subr.msk.bf16.mxu0 %vm3209_vm2, %v4538_v29 }
  0xe7   : > { %2229 = vmatmul.mubr.msk.f32.vlgmr.msra.gmra.mrb[0].mxu1 %vm455_vm0, %v312_v20  ;;  %v1574_v20 = vld [vmem:[%s4440_s3] sm:$0xff] }
  0xe8   : > { %2597 = vmatpush3.bf16.xpose.msk.msra.mxu1 %vm3209_vm2, %v3533_v4  ;;  %2230 = vmatprep.mubr.msk.f32.mxu1 %vm455_vm0, %v313_v33  ;;  %v4540_v4 = vld [vmem:[#allocation20_spill] sm:$0xff] }
  0xe9   : > { %2373 = vmatmul.mubr.msk.f32.vlgmr.msra.gmra.mrb[0].mxu0 %vm455_vm0, %v320_v43  ;;  %2600 = vmatprep.subr.msk.bf16.mxu1 %vm3209_vm2, %v3539_v52  ;;  %v4078_v52 = vld [vmem:[%s4439_s2 + $0x70] sm:$0xff]  ;;  %v1634_v43 = vrot.slane %v4092_v59, 2 }
  0xea   : > { %2789 = vmatpush3.bf16.xpose.msk.msra.mxu0 %vm3209_vm2, %v4539_v2  ;;  %2374 = vmatprep.mubr.msk.f32.mxu0 %vm455_vm0, %v321_v58 }
  0xeb   : > { %2792 = vmatprep.subr.msk.bf16.mxu0 %vm3209_vm2, %v4540_v4  ;;  %2231 = vmatmul.mubr.msk.f32.gmra.mrb[2].mxu1 %vm455_vm0, %v313_v33 }
  0xec   : > { %2264 = vmatprep.mubr.msk.f32.mxu1 %vm455_vm0, %v4064_v57  ;;  %1577 = vperm.xlu0 %2979, %v1574_v20  }
  0xed   : > { %2375 = vmatmul.mubr.msk.f32.gmra.mrb[2].mxu0 %vm455_vm0, %v321_v58 }
  0xee   : > { %2408 = vmatprep.mubr.msk.f32.mxu0 %vm455_vm0, %v4078_v52 }
  0xf0   : > { %2603 = vmatpush3.bf16.xpose.msk.msra.mxu1 %vm3209_vm2, %v3569_v16  ;;  %v4118_v16 = vsel %vm374_vm1, %v1608_v15, %v1609_v36 }
  0xf1   : > { %2606 = vmatprep.subr.msk.bf16.mxu1 %vm3209_vm2, %v3576_v49  ;;  %v1611_v49 = vrot.slane %v1588_v56, 1  ;;  %1617 = vrot.lane.b32.xlu1 %v4118_v16, %s3081_s11 }
  0xf2   : > { %2795 = vmatpush3.bf16.xpose.msk.msra.mxu0 %vm3209_vm2, %v3409_v61  ;;  %v1633_v61 = vrot.slane %v4085_v0, 2  ;;  %1625 = vrot.lane.b32.xlu0 %v4118_v16, %s3082_s12 }
  0xf3   : > { %2798 = vmatprep.subr.msk.bf16.mxu0 %vm3209_vm2, %v3446_v32  ;;  %v4125_v3 = vsel %vm374_vm1, %v1609_v36, %v1611_v49 }
  0xf4   : > { %v4141_v32 = vsel %vm750_vm3, %v1633_v61, %v1634_v43 }
  0xf5   : > { %1619 = vrot.lane.b32.xlu1 %v4125_v3, %s3081_s11 }
  0xf6   : > { %1642 = vrot.lane.b32.xlu0 %v4141_v32, %s3081_s11 }
  0xf8   : > { %2609 = vmatpush3.bf16.xpose.msk.msra.mxu1 %vm3209_vm2, %v3585_v38  ;;  %v1636_v38 = vrot.slane %v1588_v56, 2 }
  0xf9   : > { %2612 = vmatprep.subr.msk.bf16.mxu1 %vm3209_vm2, %v3599_v54  ;;  %1627 = vrot.lane.b32.xlu1 %v4125_v3, %s3082_s12 }
  0xfa   : > { %2801 = vmatpush3.bf16.xpose.msk.msra.mxu0 %vm3209_vm2, %v3467_v13  ;;  %v4151_v54 = vsel %vm750_vm3, %v1634_v43, %v1636_v38  ;;  %1650 = vrot.lane.b32.xlu0 %v4141_v32, %s3082_s12  ;;  %v1363_v13 = vrot.slane %v4009_v37, 1 }
  0xfb   : > { %2804 = vmatprep.subr.msk.bf16.mxu0 %vm3209_vm2, %v3469_v42  ;;  %v4541_v42 = vld [vmem:[#allocation31_spill] sm:$0xff] }
  0xfd   : > { %1644 = vrot.lane.b32.xlu1 %v4151_v54, %s3081_s11  ;;  %s2122_s11 = sshll.u32 %s3138_s22, 8 }
  0xfe   : > { %s4359_s15 = scalar_lea.hbm %s4442_s5, %s2122_s11 }
 0x100   : > { %2615 = vmatpush3.bf16.xpose.msk.msra.mxu1 %vm3209_vm2, %v3620_v24  ;;  %v1365_v24 = vrot.slane %v4022_v8, 1 }
 0x101   : > { %2618 = vmatprep.subr.msk.bf16.mxu1 %vm3209_vm2, %v3629_v39  ;;  %1652 = vrot.lane.b32.xlu1 %v4151_v54, %s3082_s12 }
 0x102   : > { %2807 = vmatpush3.bf16.xpose.msk.msra.mxu0 %vm3209_vm2, %v3471_v62  ;;  %v1362_v62 = vrot.slane %v4006_v7, 1 }
 0x103   : > { %2810 = vmatprep.subr.msk.bf16.mxu0 %vm3209_vm2, %v4541_v42 }
 0x108   : > { %2621 = vmatpush3.bf16.xpose.msk.msra.mxu1 %vm3209_vm2, %v3647_v60  ;;  %v4542_v60 = vld [vmem:[#allocation16_spill] sm:$0xff] }
 0x109   : > { %2624 = vmatprep.subr.msk.bf16.mxu1 %vm3209_vm2, %v3659_v63  ;;  %v315_v63 = vld [vmem:[%s4439_s2 + $0x38] sm:$0x1] }
 0x10a   : > { %2813 = vmatpush3.bf16.xpose.msk.msra.mxu0 %vm3209_vm2, %v3520_v17  ;;  %v1364_v17 = vsel %vm374_vm1, %v1362_v62, %v1363_v13 }
 0x10b   : > { %2816 = vmatprep.subr.msk.bf16.mxu0 %vm3209_vm2, %v3522_v12  ;;  %v1366_v12 = vsel %vm374_vm1, %v1363_v13, %v1365_v24 }
 0x10c   : > { %v2826_v39 = vpack.c.bf16 %v1366_v12, %v1364_v17 }
 0x110   : > { %2627 = vmatpush3.bf16.xpose.msk.msra.mxu1 %vm3209_vm2, %v3666_v6  ;;  %v323_v6 = vld [vmem:[%s4439_s2 + $0x78] sm:$0x1] }
 0x111   : > { %2630 = vmatprep.subr.msk.bf16.mxu1 %vm3209_vm2, %v3679_v50  ;;  %v325_v50 = vld [vmem:[%s4439_s2 + $0x88] sm:$0x1] }
 0x112   : > { %2819 = vmatpush3.bf16.xpose.msk.msra.mxu0 %vm3209_vm2, %v3745_v25 }
 0x113   : > { %2822 = vmatprep.subr.msk.bf16.mxu0 %vm3209_vm2, %v3751_v26 }
 0x118   : > { %2633 = vmatpush3.bf16.xpose.msk.msra.mxu1 %vm3209_vm2, %v3707_v23  ;;  %v324_v23 = vld [vmem:[%s4439_s2 + $0x80] sm:$0xff] }
 0x119   : > { %2636 = vmatprep.subr.msk.bf16.mxu1 %vm3209_vm2, %v3741_v46 }
 0x11a   : > { %2825 = vmatpush3.bf16.xpose.msk.msra.mxu0 %vm3209_vm2, %v4534_v27 }
 0x11b   : > { %2828 = vmatprep.subr.msk.bf16.mxu0 %vm3209_vm2, %v2826_v39 }
 0x120   : > { %2639 = vmatpush3.bf16.xpose.msk.msra.mxu1 %vm3209_vm2, %v4533_v48 }
 0x121   : > { %2880 = vmatprep.subr.msk.bf16.mxu1 %vm3209_vm2, %v3794_v47 }
 0x122   : > { %2831 = vmatpush3.bf16.xpose.msk.msra.mxu0 %vm3209_vm2, %v4542_v60 }
 0x123   : > { %2834 = vmatprep.subr.msk.bf16.mxu0 %vm3209_vm2, %v3794_v47 }
 0x127   : > { %2265 = vmatmul.mubr.msk.f32.vlgmr.msra.gmra.mrb[0].mxu1 %vm455_vm0, %v4064_v57 }
 0x128   : > { %2888 = vmatpush3.bf16.xpose.msk.msra.mxu1 %vm3209_vm2, %v3564_v1  ;;  %2266 = vmatprep.mubr.msk.f32.mxu1 %vm455_vm0, %v315_v63 }
 0x129   : > { %2409 = vmatmul.mubr.msk.f32.vlgmr.msra.gmra.mrb[0].mxu0 %vm455_vm0, %v4078_v52  ;;  %2881 = vmatprep.subr.msk.bf16.mxu1 %vm3209_vm2, %v3579_v19 }
 0x12a   : > { %2837 = vmatpush3.bf16.xpose.msk.msra.mxu0 %vm3209_vm2, %v3564_v1  ;;  %2410 = vmatprep.mubr.msk.f32.mxu0 %vm455_vm0, %v323_v6  ;;  %v1600_v1 = vpop.permute.xlu1 %1599 }
 0x12b   : > { %2267 = vmatmul.mubr.msk.f32.gmra.mrb[2].mxu1 %vm455_vm0, %v315_v63  ;;  %2840 = vmatprep.subr.msk.bf16.mxu0 %vm3209_vm2, %v3579_v19  ;;  %v1592_v19 = vpop.permute.xlu0 %1591 }
 0x12c   : > { %2446 = vmatprep.mubr.msk.f32.mxu1 %vm455_vm0, %v325_v50 }
 0x12d   : > { %2411 = vmatmul.mubr.msk.f32.gmra.mrb[2].mxu0 %vm455_vm0, %v323_v6 }
 0x12e   : > { %2444 = vmatprep.mubr.msk.f32.mxu0 %vm455_vm0, %v324_v23 }
 0x130   : > { %2889 = vmatpush3.bf16.xpose.msk.msra.mxu1 %vm3209_vm2, %v3593_v44 }
 0x131   : > { %2882 = vmatprep.subr.msk.bf16.mxu1 %vm3209_vm2, %v3604_v55 }
 0x132   : > { %2843 = vmatpush3.bf16.xpose.msk.msra.mxu0 %vm3209_vm2, %v3593_v44  ;;  %v1597_v44 = vmax.f32 %v4085_v0, %v1592_v19 }
 0x133   : > { %2846 = vmatprep.subr.msk.bf16.mxu0 %vm3209_vm2, %v3604_v55  ;;  %v1602_v55 = vpop.permute.xlu1 %1601 }
 0x138   : > { %2890 = vmatpush3.bf16.xpose.msk.msra.mxu1 %vm3209_vm2, %v3614_v14 }
 0x139   : > { %2883 = vmatprep.subr.msk.bf16.mxu1 %vm3209_vm2, %v3639_v53 }
 0x13a   : > { %2849 = vmatpush3.bf16.xpose.msk.msra.mxu0 %vm3209_vm2, %v3614_v14  ;;  %v1594_v14 = vpop.permute.xlu0 %1593 }
 0x13b   : > { %2852 = vmatprep.subr.msk.bf16.mxu0 %vm3209_vm2, %v3639_v53  ;;  %v1605_v53 = vmax.f32 %v1597_v44, %v1600_v1 }
 0x13d   : > { %v1615_v10 = vmax.f32 %v1605_v53, %v4118_v16 }
 0x140   : > { %2891 = vmatpush3.bf16.xpose.msk.msra.mxu1 %vm3209_vm2, %v3649_v28 }
 0x141   : > { %2884 = vmatprep.subr.msk.bf16.mxu1 %vm3209_vm2, %v3654_v31 }
 0x142   : > { %2855 = vmatpush3.bf16.xpose.msk.msra.mxu0 %vm3209_vm2, %v3649_v28 }
 0x143   : > { %2858 = vmatprep.subr.msk.bf16.mxu0 %vm3209_vm2, %v3654_v31 }
 0x148   : > { %2892 = vmatpush3.bf16.xpose.msk.msra.mxu1 %vm3209_vm2, %v3684_v22 }
 0x149   : > { %2885 = vmatprep.subr.msk.bf16.mxu1 %vm3209_vm2, %v3692_v21 }
 0x14a   : > { %2861 = vmatpush3.bf16.xpose.msk.msra.mxu0 %vm3209_vm2, %v3684_v22  ;;  %v1598_v22 = vmax.f32 %v4092_v59, %v1594_v14 }
 0x14b   : > { %2864 = vmatprep.subr.msk.bf16.mxu0 %vm3209_vm2, %v3692_v21 }
 0x14c   : > { %v1606_v21 = vmax.f32 %v1598_v22, %v1602_v55 }
 0x150   : > { %2893 = vmatpush3.bf16.xpose.msk.msra.mxu1 %vm3209_vm2, %v3702_v35 }
 0x151   : > { %2886 = vmatprep.subr.msk.bf16.mxu1 %vm3209_vm2, %v3747_v40 }
 0x152   : > { %2867 = vmatpush3.bf16.xpose.msk.msra.mxu0 %vm3209_vm2, %v3702_v35 }
 0x153   : > { %2870 = vmatprep.subr.msk.bf16.mxu0 %vm3209_vm2, %v3747_v40  ;;  %v1616_v40 = vmax.f32 %v1606_v21, %v4125_v3 }
 0x158   : > { %2894 = vmatpush3.bf16.xpose.msk.msra.mxu1 %vm3209_vm2, %v3735_v30 }
 0x159   : > { %2887 = vmatprep.subr.msk.bf16.mxu1 %vm3209_vm2, %v4032_v45 }
 0x15a   : > { %2873 = vmatpush3.bf16.xpose.msk.msra.mxu0 %vm3209_vm2, %v3735_v30 }
 0x15b   : > { %2876 = vmatprep.subr.msk.bf16.mxu0 %vm3209_vm2, %v4032_v45 }
 0x160   : > { %2895 = vmatpush3.bf16.xpose.msk.msra.mxu1 %vm3209_vm2, %v3770_v5 }
 0x162   : > { %2879 = vmatpush3.bf16.xpose.msk.msra.mxu0 %vm3209_vm2, %v3770_v5 }
 0x163   : > { %v1618_v31 = vpop.permute.xlu1 %1617 }
 0x164   : > { %v1623_v35 = vmax.f32 %v1615_v10, %v1618_v31 }
 0x167   : > { %2447 = vmatmul.mubr.msk.f32.vlgmr.msra.gmra.mrb[4].mxu1 %vm455_vm0, %v325_v50  ;;  %v1620_v46 = vpop.permute.xlu1 %1619 }
 0x168   : > { %v1624_v48 = vmax.f32 %v1616_v40, %v1620_v46 }
 0x169   : > { %2445 = vmatmul.mubr.msk.f32.vlgmr.msra.gmra.mrb[0].mxu0 %vm455_vm0, %v324_v23 }
 0x16b   : > { %v4338_v28 = vpop.permute.xlu0 %1577  ;;  %v1628_v5 = vpop.permute.xlu1 %1627 }
 0x16c   : > { %v1632_v7 = vmax.f32 %v1624_v48, %v1628_v5 }
 0x16e   : > { %v1641_v8 = vmax.f32 %v1632_v7, %v4151_v54 }
 0x16f   : > { %v1626_v30 = vpop.permute.xlu0 %1625  ;;  %v1645_v18 = vpop.permute.xlu1 %1644 }
 0x170   : > { %v1631_v25 = vmax.f32 %v1623_v35, %v1626_v30  ;;  %v1649_v9 = vmax.f32 %v1641_v8, %v1645_v18 }
 0x172   : > { %v1640_v27 = vmax.f32 %v1631_v25, %v4141_v32 }
 0x173   : > { %v1643_v26 = vpop.permute.xlu0 %1642  ;;  %v1653_v41 = vpop.permute.xlu1 %1652 }
 0x174   : > { %v1648_v47 = vmax.f32 %v1640_v27, %v1643_v26  ;;  %v1657_v34 = vmax.f32 %v1649_v9, %v1653_v41 }
 0x176   : > { %1660 = vst.msk [vmem:[%s243_s10 + $0x8] sm:$0xff] %vm1658_vm4, %v1657_v34 }
 0x177   : > { %v1651_v37 = vpop.permute.xlu0 %1650 }
 0x178   : > { %v1656_v11 = vmax.f32 %v1648_v47, %v1651_v37 }
 0x17a   : > { %1659 = vst.msk [vmem:[%s243_s10] sm:$0xff] %vm1658_vm4, %v1656_v11 }
 0x17b   : > { %2997 = shalt.err (!%p2994_p3)
}
 0x17c   : > { %s2998_s26 = scalar_lea.hbm %s4359_s15, 256  ;;  %s3002_s10 = scalar_lea.hbm %s4442_s5, 512 }
 0x17d   : > { %p2999_p4 = scmp.ne.s32.totalorder %s4359_s15, %s2998_s26  ;;  %p3003_p9 = scmp.lt.u32.totalorder %s4359_s15, %s4442_s5 }
 0x17e   : > { %p3004_p10 = scmp.lt.u32.totalorder %s3002_s10, %s2998_s26  ;;  %p3006_p12 = scmp.lt.u32.totalorder %s2998_s26, %s4359_s15 }
 0x17f   : > { %p3000_p7 = pnand %p2999_p4, %p3155_p5 }
 0x180   : > { %p3005_p11 = por %p3004_p10, %p3003_p9 }
 0x181   : > { %p3001_p8 = pneg %p3000_p7 }
 0x182   : > { %p3007_p13 = por %p3006_p12, %p3005_p11 }
 0x184   : > { %p3008_p0 = pnand %p3007_p13, %p3001_p8 }
 0x186   : > { %3011 = shalt.err (!%p3008_p0)
}
 0x187   : > { %s3084_s16 = smov 128   ;;  %s3085_s17 = smov 8   ;;  %v1564_v43 = vlaneseq }
 0x188   : > { %2931 = dma.vmem_to_hbm [thread:$0]  (%p3155_p5), %s4352_s9, 256, %s4359_s15, %s1667_s13, %s3084_s16, %s3084_s16, %s3085_s17  }
 0x189   : > { %v1565_v3 = vshrl.u32 %v1564_v43, 7  ;;  %s236_s9 = scalar_lea.vmem [#allocation2], %s1804_s8  ;;  %s4394_s25 = scalar_lea.hbm %s4441_s4, %s2122_s11 }
 0x18a   : > { %s1681_s15 = sshll.u32 %s236_s9, 4  ;;  %s1662_s26 = scalar_lea.sflag [#allocation3], %s4345_s7  ;;  %s4396_s15 = int_to_ptr.vmem [resolvable:$true] %s1681_s15 }
 0x18b   : > { %v1566_v13 = vsub.s32 0, %v1565_v3  ;;  %s3012_s8 = scalar_lea.vmem %s4396_s15, 256  ;;  %s3086_s30 = smov [#allocation2]  }
 0x18c   : > { %p3013_p1 = scmp.ne.s32.totalorder %s4396_s15, %s3012_s8  ;;  %s3016_s22 = sshll.u32 %s3086_s30, 4  ;;  %s3017_s22 = int_to_ptr.vmem [resolvable:$false] %s3016_s22 }
 0x18d   : > { %s3018_s6 = scalar_lea.vmem %s3017_s22, 512  ;;  %p3019_p4 = scmp.lt.s32.totalorder %s4396_s15, %s3017_s22 }
 0x18e   : > { %p3014_p2 = pnand %p3013_p1, %p3155_p5  ;;  %p3020_p7 = scmp.lt.s32.totalorder %s3018_s6, %s3012_s8 }
 0x190   : > { %p3015_p3 = pneg %p3014_p2  ;;  %p3021_p8 = por %p3020_p7, %p3019_p4 }
 0x192   : > { %p3022_p9 = pnand %p3021_p8, %p3015_p3 }
 0x1fa   : > { %v1060_v45 = vpop.f32.mrb[0].mxu1 }
 0x1fb   : > { %v1062_v29 = vpop.f32.mrb[1].mxu1 }
 0x1fe   : > { %v1066_v33 = vpop.f32.mrb[2].mxu1 }
 0x1ff   : > { %v1068_v58 = vpop.f32.mrb[3].mxu1 }
 0x200   : > { %v1449_v57 = vpop.f32.mrb[2].mxu0 }
 0x201   : > { %v2898_v2 = vadd.f32 %v1449_v57, %v1066_v33  ;;  %v1451_v4 = vpop.f32.mrb[3].mxu0 }
 0x202   : > { %v2900_v52 = vadd.f32 %v1451_v4, %v1068_v58 }
 0x23a   : > { %v1545_v0 = vpop.f32.mrb[4].mxu1 }
 0x23b   : > { %v2899_v51 = vadd.f32 %v2898_v2, %v1545_v0  ;;  %v1547_v59 = vpop.f32.mrb[5].mxu1 }
 0x23c   : > { %v1539_v15 = vpop.f32.mrb[0].mxu0  ;;  %v2901_v36 = vadd.f32 %v2900_v52, %v1547_v59 }
 0x23d   : > { %v2896_v56 = vadd.f32 %v1539_v15, %v1060_v45  ;;  %v1554_v20 = vadd.f32 1e-08, %v2899_v51  ;;  %v1541_v16 = vpop.f32.mrb[1].mxu0 }
 0x23e   : > { %v2897_v49 = vadd.f32 %v1541_v16, %v1062_v29  ;;  %v1555_v61 = vadd.f32 1e-08, %v2901_v36 }
 0x23f   : > { %2980 = vrcp.f32 %v1554_v20 }
 0x240   : > { %2982 = vrcp.f32 %v1555_v61 }
 0x249   : > { %v2981_v32 = vpop.eup %2980 }
 0x24a   : > { %v2983_v38 = vpop.eup %2982  ;;  %v1558_v54 = vmul.f32 %v2981_v32, %v1554_v20 }
 0x24b   : > { %v1559_v42 = vmul.f32 %v2983_v38, %v1555_v61 }
 0x24c   : > { %v1560_v62 = vsub.f32 2.0, %v1558_v54 }
 0x24d   : > { %v1561_v24 = vsub.f32 2.0, %v1559_v42 }
 0x24e   : > { %v1562_v17 = vmul.f32 %v2981_v32, %v1560_v62 }
 0x24f   : > { %v1563_v12 = vmul.f32 %v2983_v38, %v1561_v24 }
 0x250   : > { %v1567_v39 = vrot.slane %v1562_v17, %v1566_v13 }
 0x251   : > { %v1571_v60 = vrot.slane %v1563_v12, %v1566_v13 }
 0x252   : > { %v1572_v63 = vmul.f32 %v2896_v56, %v1567_v39 }
 0x253   : > { %v1573_v6 = vmul.f32 %v2897_v49, %v1571_v60 }
 0x254   : > { %v1580_v50 = vadd.f32 %v4338_v28, %v1572_v63 }
 0x255   : > { %v1581_v23 = vadd.f32 %v4338_v28, %v1573_v6 }
 0x256   : > { %v1582_v1 = vmax.f32 %v1580_v50, 0.0 }
 0x257   : > { %v1583_v19 = vmax.f32 %v1581_v23, 0.0 }
 0x258   : > { %1584 = vst [vmem:[%s236_s9] sm:$0xff] %v1582_v1 }
 0x259   : > { %1585 = vst [vmem:[%s236_s9 + $0x8] sm:$0xff] %v1583_v19 }
 0x25a   : > { %3025 = shalt.err (!%p3022_p9)
}
 0x25b   : > { %s3026_s7 = scalar_lea.hbm %s4394_s25, 256  ;;  %s3030_s12 = scalar_lea.hbm %s4441_s4, 512 }
 0x25c   : > { %p3027_p10 = scmp.ne.s32.totalorder %s4394_s25, %s3026_s7  ;;  %p3031_p13 = scmp.lt.u32.totalorder %s4394_s25, %s4441_s4 }
 0x25d   : > { %p3032_p0 = scmp.lt.u32.totalorder %s3030_s12, %s3026_s7  ;;  %p3034_p2 = scmp.lt.u32.totalorder %s3026_s7, %s4394_s25 }
 0x25e   : > { %p3028_p11 = pnand %p3027_p10, %p3155_p5 }
 0x25f   : > { %p3033_p1 = por %p3032_p0, %p3031_p13 }
 0x260   : > { %p3029_p12 = pneg %p3028_p11 }
 0x261   : > { %p3035_p3 = por %p3034_p2, %p3033_p1 }
 0x263   : > { %p3036_p4 = pnand %p3035_p3, %p3029_p12 }
 0x265   : > { %3039 = shalt.err (!%p3036_p4)
}
 0x266   : > { %2930 = dma.vmem_to_hbm [thread:$0]  (%p3155_p5), %s4396_s15, 256, %s4394_s25, %s1662_s26  }
 0x267 PF: > { %p2941_p7 = scmp.ge.s32.totalorder %s3078_s21, 2  ;;  %s1709_s17 = sand.u32 1, %s3066_s18  }
 0x268   : > { %s1710_s9 = scalar_lea.sflag [#allocation3], %s1709_s17 }
 0x269   : > { %p2935_p8 = pnand %p2941_p7, %p3159_p6 }
 0x26b   : > { %3057 = dma.done.wait (!%p2935_p8), %s1710_s9, 256  }
 0x26c   : > { %3059 = vsyncadd (!%p2935_p8), %s1710_s9, 4294967040  ;;  %s1719_s13 = scalar_lea.sflag [#allocation5], %s1709_s17 }
 0x26d   : > { %3061 = dma.done.wait (!%p2935_p8), %s1719_s13, 256  }
 0x26e   : > { %3063 = vsyncadd (!%p2935_p8), %s1719_s13, 4294967040  ;;  %p19_p5 = scmp.ge.s32.totalorder %s3142_s24, 4   ;;  %s4543_s18 = smov %s3070_s19 }
 0x26f   : > { %s4544_s19 = smov %s3074_s20  ;;  %s4545_s20 = smov %s3153_s27 }
 0x270   : > { %s4546_s21 = smov %s3142_s24  ;;  %21 = sbr.rel (!%p19_p5) target bundleno = 5 (0x5), region = 91 }
 0x277   :  { %1724 = vsyncpa [#allocation3], 1 }
 0x278   :  { %1726 = vsyncpa [#allocation3 + $0x1], 1 }
 0x279   :  { %1727 = vsyncpa [#allocation5], 1 }
 0x27a   :  { %1729 = vsyncpa [#allocation5 + $0x1], 1 }

</bundles_post_ra>
